<compile_context>
chip_gen: v6e
topology: v6e:2x2x1
jax: 0.10.0
libtpu: 0.0.40
codegen_flags: <defaults>
</compile_context>

<pallas_src>
import math

import jax
import jax.numpy as jnp
import numpy as np
from jax import lax
from jax.experimental import pallas as pl
from jax.experimental.pallas import tpu as pltpu


def _round_up(x, m):
    return (x + m - 1) // m * m


# ----------------------------------------------------------------------------
# Fused BiLSTM + Linear kernel
# ----------------------------------------------------------------------------
def _make_bilstm_kernel(T, BB, HP, mxu_dtype):
    """Closure over static T (seq len), BB (batch block), HP (padded hidden)."""
    S = 2 * HP  # fused state width [h_fwd | h_bwd]; multiple of 128 (lane-dense)

    def kernel(x_ref, xr_ref, wif_ref, wib_ref, bf_ref, bb_ref, whh_ref,
               wef_ref, web_ref, be_ref, out_ref, gx_sc, rec_f_sc, rec_b_sc):
        # ---- prologue: hoisted input projections, biases folded, ONE dense gx ----
        # gxf[t] = x_t @ W_ih_f + b_f            (gate groups [i|f|o|g], fwd dir)
        # gxb[t] = x_{T-1-t} @ W_ih_b + b_b      (x was time-reversed in the wrapper)
        gxf = (jnp.dot(x_ref[...], wif_ref[...],
                       preferred_element_type=jnp.float32) + bf_ref[...])
        gxb = (jnp.dot(xr_ref[...], wib_ref[...],
                       preferred_element_type=jnp.float32) + bb_ref[...])
        # interleave directions once, outside the recurrence:
        # columns become [i_f|i_b | f_f|f_b | o_f|o_b | g_f|g_b], written to scratch.
        parts = []
        for k in range(4):
            parts.append(gxf[:, k * HP:(k + 1) * HP])
            parts.append(gxb[:, k * HP:(k + 1) * HP])
        gx_sc[...] = jnp.concatenate(parts, axis=-1)          # (T*BB, 8*HP) f32

        whh = whh_ref[...]    # (2HP, 8HP): rows 0:HP act on h_fwd, HP:2HP on h_bwd

        # ---- fused fwd+bwd recurrence ----
        def step(t, carry):
            h_m, c = carry                                    # h_m: mxu dtype, c: f32
            rf = t * BB                                       # fwd row block (time t)
            rb = (T - 1 - t) * BB                             # bwd row block (time T-1-t)
            if not isinstance(t, int):
                rf = pl.multiple_of(rf, BB)
                rb = pl.multiple_of(rb, BB)
            g = (jnp.dot(h_m, whh, preferred_element_type=jnp.float32)
                 + gx_sc[pl.ds(rf, BB), :])                   # (BB, 8HP) f32
            sg = jax.nn.sigmoid(g[:, 0:3 * S])                # i|f|o : one EUP pass
            gg = jnp.tanh(g[:, 3 * S:4 * S])                  # g     : one EUP pass
            c = sg[:, S:2 * S] * c + sg[:, 0:S] * gg          # [c_f | c_b] (f32)
            h = sg[:, 2 * S:3 * S] * jnp.tanh(c)              # [h_f | h_b] (f32)
            # full-width stores (no half-lane slices / masked stores in the loop)
            rec_f_sc[pl.ds(rf, BB), :] = h
            rec_b_sc[pl.ds(rb, BB), :] = h
            return h.astype(mxu_dtype), c

        carry = (jnp.zeros((BB, S), mxu_dtype), jnp.zeros((BB, S), jnp.float32))
        if T <= 16:
            for t in range(T):                                # tiny static T: full unroll
                carry = step(t, carry)
        else:
            carry = lax.fori_loop(0, T, step, carry, unroll=4)

        # ---- fused embedding: concat([h_fwd, h_bwd], -1) @ W_emb + b, with the
        # fwd/bwd column selection baked into zero-padded weights.
        out = (jnp.dot(rec_f_sc[...].astype(mxu_dtype), wef_ref[...],
                       preferred_element_type=jnp.float32)
               + jnp.dot(rec_b_sc[...].astype(mxu_dtype), web_ref[...],
                         preferred_element_type=jnp.float32)
               + be_ref[...])                                 # (T*BB, NOP)
        out_ref[...] = out.astype(out_ref.dtype)

    return kernel


# ----------------------------------------------------------------------------
# Parameter packing ([i|f|o|g] gate order, direction-interleaved, padded)
# ----------------------------------------------------------------------------
def _reorder_ifog(a):
    """PyTorch gate order [i,f,g,o] -> [i,f,o,g] along the last axis."""
    H = a.shape[-1] // 4
    i, f, g, o = (a[..., k * H:(k + 1) * H] for k in range(4))
    return jnp.concatenate([i, f, o, g], axis=-1)


def _pad_gate_cols(a, H, HP):
    """Zero-pad each of the 4 gate blocks (width H) to width HP along the last axis."""
    if HP == H:
        return a
    blocks = []
    for k in range(4):
        blk = a[..., k * H:(k + 1) * H]
        blocks.append(jnp.pad(blk, [(0, 0)] * (a.ndim - 1) + [(0, HP - H)]))
    return jnp.concatenate(blocks, axis=-1)


def _interleave_dirs(af, ab, HP):
    """Per-direction [i|f|o|g] blocks -> [i_f|i_b|f_f|f_b|o_f|o_b|g_f|g_b]."""
    parts = []
    for k in range(4):
        parts.append(af[..., k * HP:(k + 1) * HP])
        parts.append(ab[..., k * HP:(k + 1) * HP])
    return jnp.concatenate(parts, axis=-1)


def _pack_params(p, H, HP, nOut, NOP, mxu_dtype):
    # dense per-direction input projections (no zero-padded direction columns)
    wif = _pad_gate_cols(_reorder_ifog(p["wih_f_t"]), H, HP)     # (nIn, 4HP)
    wib = _pad_gate_cols(_reorder_ifog(p["wih_b_t"]), H, HP)     # (nIn, 4HP)
    bf = _pad_gate_cols(_reorder_ifog(p["b_f"]), H, HP)          # (1, 4HP)
    bb = _pad_gate_cols(_reorder_ifog(p["b_b"]), H, HP)          # (1, 4HP)

    # block recurrent weight (zeros are free inside the padded MXU tile)
    whf = jnp.pad(_pad_gate_cols(_reorder_ifog(p["whh_f_t"]), H, HP),
                  ((0, HP - H), (0, 0)))                         # (HP, 4HP)
    whb = jnp.pad(_pad_gate_cols(_reorder_ifog(p["whh_b_t"]), H, HP),
                  ((0, HP - H), (0, 0)))                         # (HP, 4HP)
    z = jnp.zeros_like(whf)
    whh = jnp.concatenate([_interleave_dirs(whf, z, HP),
                           _interleave_dirs(z, whb, HP)], axis=0)  # (2HP, 8HP)

    # embedding halves zero-padded to (2HP, NOP) so the loop stores full h blocks
    wemb = p["w_emb_t"]                                          # (2H, nOut)
    wef = jnp.zeros((2 * HP, NOP), jnp.float32).at[:H, :nOut].set(wemb[:H])
    web = jnp.zeros((2 * HP, NOP), jnp.float32).at[HP:HP + H, :nOut].set(wemb[H:])
    be = jnp.zeros((1, NOP), jnp.float32).at[:, :nOut].set(p["b_emb"])

    return {
        "wif": wif.astype(mxu_dtype), "wib": wib.astype(mxu_dtype),
        "bf": bf.astype(jnp.float32), "bb": bb.astype(jnp.float32),
        "whh": whh.astype(mxu_dtype),
        "wef": wef.astype(mxu_dtype), "web": web.astype(mxu_dtype),
        "be": be.astype(jnp.float32),
    }


# ----------------------------------------------------------------------------
# Forward wrapper
# ----------------------------------------------------------------------------
def bidirectional_lstm_forward(x, params, *, mxu_dtype=jnp.bfloat16, batch_block=None):
    """Equivalent of BidirectionalLSTM.forward. x: (T, B, nIn) -> (T, B, nOut)."""
    T, B, nIn = x.shape
    H = params["whh_f_t"].shape[0]
    nOut = params["w_emb_t"].shape[1]

    HP = _round_up(H, 64)         # 2*HP multiple of 128 -> lane-dense gate/state slices
    NOP = _round_up(nOut, 128)    # lane-dense output stores (unmasked vst)
    BP = _round_up(max(B, 1), 8)  # f32 sublane multiple
    if batch_block is None:
        # single block for small batches; otherwise split so v7x can use both TCs
        batch_block = BP if BP <= 8 else _round_up((BP + 1) // 2, 8)
    BB = batch_block
    BP = _round_up(BP, BB)
    NB = BP // BB
    rows = T * BB

    pk = _pack_params(params, H, HP, nOut, NOP, mxu_dtype)

    x_pad = jnp.pad(x, ((0, 0), (0, BP - B), (0, 0)))
    x_rev = x_pad[::-1]                                          # time-reversed copy

    def to_blocks(a):  # (T, BP, nIn) -> (NB, T*BB, nIn), time-major within a block
        return (a.reshape(T, NB, BB, nIn).transpose(1, 0, 2, 3)
                 .reshape(NB, rows, nIn).astype(mxu_dtype))

    xb, xrb = to_blocks(x_pad), to_blocks(x_rev)

    mxu_bytes = np.dtype(mxu_dtype).itemsize
    est = (rows * 8 * HP * 4 + 2 * rows * 2 * HP * 4             # gx + rec scratches (f32)
           + 2 * (2 * rows * nIn * mxu_bytes)                    # x, x_rev (double-buffered)
           + 2 * (rows * NOP * 4)                                # out (double-buffered)
           + 2 * mxu_bytes * (2 * nIn * 4 * HP + 2 * HP * 8 * HP + 2 * 2 * HP * NOP)
           + 2 * 4 * (2 * 4 * HP + NOP))
    vmem_limit = int(min(64 << 20, max(16 << 20, 2 * est)))

    wspec = lambda shape: pl.BlockSpec(shape, lambda nb: (0, 0))
    xspec = pl.BlockSpec((None, rows, nIn), lambda nb: (nb, 0, 0))

    out_blocks = pl.pallas_call(
        _make_bilstm_kernel(T, BB, HP, mxu_dtype),
        out_shape=jax.ShapeDtypeStruct((NB, rows, NOP), jnp.float32),
        grid=(NB,),
        in_specs=[
            xspec, xspec,
            wspec((nIn, 4 * HP)), wspec((nIn, 4 * HP)),
            wspec((1, 4 * HP)), wspec((1, 4 * HP)),
            wspec((2 * HP, 8 * HP)),
            wspec((2 * HP, NOP)), wspec((2 * HP, NOP)),
            wspec((1, NOP)),
        ],
        out_specs=pl.BlockSpec((None, rows, NOP), lambda nb: (nb, 0, 0)),
        scratch_shapes=[
            pltpu.VMEM((rows, 8 * HP), jnp.float32),  # hoisted gate preactivations gx
            pltpu.VMEM((rows, 2 * HP), jnp.float32),  # fwd-time-ordered h sequence
            pltpu.VMEM((rows, 2 * HP), jnp.float32),  # bwd-time-ordered h sequence
        ],
        compiler_params=pltpu.CompilerParams(
            dimension_semantics=("parallel",),
            vmem_limit_bytes=vmem_limit),
    )(xb, xrb, pk["wif"], pk["wib"], pk["bf"], pk["bb"], pk["whh"],
      pk["wef"], pk["web"], pk["be"])

    out = (out_blocks.reshape(NB, T, BB, NOP).transpose(1, 0, 2, 3)
           .reshape(T, BP, NOP))
    return out[:, :B, :nOut]


# ----------------------------------------------------------------------------
# Pure-JAX reference (for verification)
# ----------------------------------------------------------------------------
def _lstm_dir_ref(x, w_ih_t, w_hh_t, bias):
    H = w_hh_t.shape[0]

    def step(carry, x_t):
        h, c = carry
        gates = x_t @ w_ih_t + h @ w_hh_t + bias[0]
        i = jax.nn.sigmoid(gates[:, 0 * H:1 * H])
        f = jax.nn.sigmoid(gates[:, 1 * H:2 * H])
        g = jnp.tanh(gates[:, 2 * H:3 * H])
        o = jax.nn.sigmoid(gates[:, 3 * H:4 * H])
        c = f * c + i * g
        h = o * jnp.tanh(c)
        return (h, c), h

    B = x.shape[1]
    init = (jnp.zeros((B, H), jnp.float32), jnp.zeros((B, H), jnp.float32))
    _, hs = lax.scan(step, init, x)
    return hs


def reference_forward(x, params):
    T, B, _ = x.shape
    h_fwd = _lstm_dir_ref(x, params["wih_f_t"], params["whh_f_t"], params["b_f"])
    h_bwd = _lstm_dir_ref(
        x[::-1], params["wih_b_t"], params["whh_b_t"], params["b_b"]
    )[::-1]
    rec = jnp.concatenate([h_fwd, h_bwd], axis=-1).reshape(T * B, -1)
    out = rec @ params["w_emb_t"] + params["b_emb"][0]
    return out.reshape(T, B, -1)


# ----------------------------------------------------------------------------
# Deterministic parameter initialization (shapes from nn.LSTM / nn.Linear)
# ----------------------------------------------------------------------------
def init_params(key, nIn, nHidden, nOut):
    ks = jax.random.split(key, 11)
    s = 1.0 / math.sqrt(nHidden)
    u = lambda k, shape: jax.random.uniform(k, shape, jnp.float32, -s, s)

    wih_f = u(ks[0], (4 * nHidden, nIn))
    whh_f = u(ks[1], (4 * nHidden, nHidden))
    b_f = u(ks[2], (4 * nHidden,)) + u(ks[3], (4 * nHidden,))  # b_ih + b_hh
    wih_b = u(ks[4], (4 * nHidden, nIn))
    whh_b = u(ks[5], (4 * nHidden, nHidden))
    b_b = u(ks[6], (4 * nHidden,)) + u(ks[7], (4 * nHidden,))

    se = 1.0 / math.sqrt(2 * nHidden)
    w_emb = jax.random.uniform(ks[8], (nOut, 2 * nHidden), jnp.float32, -se, se)
    b_emb = jax.random.uniform(ks[9], (nOut,), jnp.float32, -se, se)

    return {
        "wih_f_t": wih_f.T, "whh_f_t": whh_f.T, "b_f": b_f[None, :],
        "wih_b_t": wih_b.T, "whh_b_t": whh_b.T, "b_b": b_b[None, :],
        "w_emb_t": w_emb.T, "b_emb": b_emb[None, :],
    }


# ----------------------------------------------------------------------------
if __name__ == "__main__":
    T, B, nIn, nHidden, nOut = 8, 2, 16, 32, 16

    key = jax.random.PRNGKey(0)
    k_x, k_p, k_x2 = jax.random.split(key, 3)
    x = jax.random.normal(k_x, (T, B, nIn), jnp.float32)
    params = init_params(k_p, nIn, nHidden, nOut)
    ref = jax.block_until_ready(reference_forward(x, params))

    # f32 MXU path: tight parity with the pure-JAX reference.
    out_f32 = jax.block_until_ready(
        bidirectional_lstm_forward(x, params, mxu_dtype=jnp.float32))
    assert out_f32.shape == (T, B, nOut), out_f32.shape
    np.testing.assert_allclose(np.asarray(out_f32), np.asarray(ref),
                               rtol=1e-3, atol=2e-3)

    # bf16 MXU-operand path (recommended on v6e/v7x): looser tolerance.
    out_bf16 = jax.block_until_ready(
        bidirectional_lstm_forward(x, params, mxu_dtype=jnp.bfloat16))
    np.testing.assert_allclose(np.asarray(out_bf16), np.asarray(ref),
                               rtol=3e-2, atol=3e-2)

    # larger batch -> exercises the parallel batch-grid path (NB=2 blocks).
    x2 = jax.random.normal(k_x2, (T, 16, nIn), jnp.float32)
    ref2 = jax.block_until_ready(reference_forward(x2, params))
    out2 = jax.block_until_ready(
        bidirectional_lstm_forward(x2, params, mxu_dtype=jnp.bfloat16))
    assert out2.shape == (T, 16, nOut), out2.shape
    np.testing.assert_allclose(np.asarray(out2), np.asarray(ref2),
                               rtol=3e-2, atol=3e-2)

    print("KERNEL_OK")
</pallas_src>

<mosaic_0001>
module attributes {stable_mosaic.version = 11 : i64} {
  func.func @kernel(%arg0: i32, %arg1: memref<1x64x16xf32, #tpu.memory_space<vmem>>, %arg2: memref<1x64x16xf32, #tpu.memory_space<vmem>>, %arg3: memref<16x256xf32, #tpu.memory_space<vmem>>, %arg4: memref<16x256xf32, #tpu.memory_space<vmem>>, %arg5: memref<1x256xf32, #tpu.memory_space<vmem>>, %arg6: memref<1x256xf32, #tpu.memory_space<vmem>>, %arg7: memref<128x512xf32, #tpu.memory_space<vmem>>, %arg8: memref<128x128xf32, #tpu.memory_space<vmem>>, %arg9: memref<128x128xf32, #tpu.memory_space<vmem>>, %arg10: memref<1x128xf32, #tpu.memory_space<vmem>>, %arg11: memref<1x64x128xf32, #tpu.memory_space<vmem>>, %arg12: memref<64x512xf32, #tpu.memory_space<vmem>>, %arg13: memref<64x128xf32, #tpu.memory_space<vmem>>, %arg14: memref<64x128xf32, #tpu.memory_space<vmem>>) attributes {dimension_semantics = [#tpu.dimension_semantics<parallel>], iteration_bounds = array<i64: 1>, scalar_prefetch = 0 : i64, scratch_operands = 3 : i64, tpu.core_type = #tpu.core_type<tc>, window_params = [{transform_indices = @transform_0, window_bounds = array<i64: 1, 64, 16>}, {transform_indices = @transform_1, window_bounds = array<i64: 1, 64, 16>}, {pipeline_mode = #tpu.pipeline_mode<synchronous>, transform_indices = @transform_2, window_bounds = array<i64: 16, 256>}, {pipeline_mode = #tpu.pipeline_mode<synchronous>, transform_indices = @transform_3, window_bounds = array<i64: 16, 256>}, {pipeline_mode = #tpu.pipeline_mode<synchronous>, transform_indices = @transform_4, window_bounds = array<i64: 1, 256>}, {pipeline_mode = #tpu.pipeline_mode<synchronous>, transform_indices = @transform_5, window_bounds = array<i64: 1, 256>}, {pipeline_mode = #tpu.pipeline_mode<synchronous>, transform_indices = @transform_6, window_bounds = array<i64: 128, 512>}, {pipeline_mode = #tpu.pipeline_mode<synchronous>, transform_indices = @transform_7, window_bounds = array<i64: 128, 128>}, {pipeline_mode = #tpu.pipeline_mode<synchronous>, transform_indices = @transform_8, window_bounds = array<i64: 128, 128>}, {pipeline_mode = #tpu.pipeline_mode<synchronous>, transform_indices = @transform_9, window_bounds = array<i64: 1, 128>}, {transform_indices = @transform_10, window_bounds = array<i64: 1, 64, 128>}]} {
    %c0 = arith.constant 0 : index
    %c0_0 = arith.constant 0 : index
    %c0_1 = arith.constant 0 : index
    %0 = vector.load %arg1[%c0, %c0_0, %c0_1] : memref<1x64x16xf32, #tpu.memory_space<vmem>>, vector<1x64x16xf32>
    %1 = vector.shape_cast %0 : vector<1x64x16xf32> to vector<64x16xf32>
    %c0_2 = arith.constant 0 : index
    %c0_3 = arith.constant 0 : index
    %2 = vector.load %arg3[%c0_2, %c0_3] : memref<16x256xf32, #tpu.memory_space<vmem>>, vector<16x256xf32>
    %cst = arith.constant dense<0.000000e+00> : vector<64x256xf32>
    %3 = tpu.matmul %1, %2, %cst {dimension_numbers = #tpu.dot_dimension_numbers<[1], [0], [0], [1], [0, 0, 1, 1], [], []>} : vector<64x16xf32>, vector<16x256xf32>, vector<64x256xf32> -> vector<64x256xf32>
    %c0_4 = arith.constant 0 : index
    %c0_5 = arith.constant 0 : index
    %4 = vector.load %arg5[%c0_4, %c0_5] : memref<1x256xf32, #tpu.memory_space<vmem>>, vector<1x256xf32>
    %5 = vector.broadcast %4 : vector<1x256xf32> to vector<64x256xf32>
    %6 = arith.addf %3, %5 : vector<64x256xf32>
    %c0_6 = arith.constant 0 : index
    %c0_7 = arith.constant 0 : index
    %c0_8 = arith.constant 0 : index
    %7 = vector.load %arg2[%c0_6, %c0_7, %c0_8] : memref<1x64x16xf32, #tpu.memory_space<vmem>>, vector<1x64x16xf32>
    %8 = vector.shape_cast %7 : vector<1x64x16xf32> to vector<64x16xf32>
    %c0_9 = arith.constant 0 : index
    %c0_10 = arith.constant 0 : index
    %9 = vector.load %arg4[%c0_9, %c0_10] : memref<16x256xf32, #tpu.memory_space<vmem>>, vector<16x256xf32>
    %cst_11 = arith.constant dense<0.000000e+00> : vector<64x256xf32>
    %10 = tpu.matmul %8, %9, %cst_11 {dimension_numbers = #tpu.dot_dimension_numbers<[1], [0], [0], [1], [0, 0, 1, 1], [], []>} : vector<64x16xf32>, vector<16x256xf32>, vector<64x256xf32> -> vector<64x256xf32>
    %c0_12 = arith.constant 0 : index
    %c0_13 = arith.constant 0 : index
    %11 = vector.load %arg6[%c0_12, %c0_13] : memref<1x256xf32, #tpu.memory_space<vmem>>, vector<1x256xf32>
    %12 = vector.broadcast %11 : vector<1x256xf32> to vector<64x256xf32>
    %13 = arith.addf %10, %12 : vector<64x256xf32>
    %14 = vector.extract_strided_slice %6 {offsets = [0, 0], sizes = [64, 64], strides = [1, 1]} : vector<64x256xf32> to vector<64x64xf32>
    %15 = vector.extract_strided_slice %13 {offsets = [0, 0], sizes = [64, 64], strides = [1, 1]} : vector<64x256xf32> to vector<64x64xf32>
    %16 = vector.extract_strided_slice %6 {offsets = [0, 64], sizes = [64, 64], strides = [1, 1]} : vector<64x256xf32> to vector<64x64xf32>
    %17 = vector.extract_strided_slice %13 {offsets = [0, 64], sizes = [64, 64], strides = [1, 1]} : vector<64x256xf32> to vector<64x64xf32>
    %18 = vector.extract_strided_slice %6 {offsets = [0, 128], sizes = [64, 64], strides = [1, 1]} : vector<64x256xf32> to vector<64x64xf32>
    %19 = vector.extract_strided_slice %13 {offsets = [0, 128], sizes = [64, 64], strides = [1, 1]} : vector<64x256xf32> to vector<64x64xf32>
    %20 = vector.extract_strided_slice %6 {offsets = [0, 192], sizes = [64, 64], strides = [1, 1]} : vector<64x256xf32> to vector<64x64xf32>
    %21 = vector.extract_strided_slice %13 {offsets = [0, 192], sizes = [64, 64], strides = [1, 1]} : vector<64x256xf32> to vector<64x64xf32>
    %22 = tpu.concatenate %14, %15, %16, %17, %18, %19, %20, %21 in 1 : vector<64x64xf32>, vector<64x64xf32>, vector<64x64xf32>, vector<64x64xf32>, vector<64x64xf32>, vector<64x64xf32>, vector<64x64xf32>, vector<64x64xf32> -> vector<64x512xf32>
    %c0_14 = arith.constant 0 : index
    %c0_15 = arith.constant 0 : index
    %23 = vector.load %arg12[%c0_14, %c0_15] : memref<64x512xf32, #tpu.memory_space<vmem>>, vector<64x512xf32>
    tpu.vector_store %arg12[%c0_14, %c0_15], %22 {strides = array<i32>} : memref<64x512xf32, #tpu.memory_space<vmem>>, vector<64x512xf32>,
    %c0_16 = arith.constant 0 : index
    %c0_17 = arith.constant 0 : index
    %24 = vector.load %arg7[%c0_16, %c0_17] : memref<128x512xf32, #tpu.memory_space<vmem>>, vector<128x512xf32>
    %cst_18 = arith.constant 0.000000e+00 : f32
    %25 = vector.broadcast %cst_18 : f32 to vector<8x128xf32>
    %cst_19 = arith.constant 0.000000e+00 : f32
    %26 = vector.broadcast %cst_19 : f32 to vector<8x128xf32>
    %cst_20 = arith.constant dense<0.000000e+00> : vector<8x512xf32>
    %27 = tpu.matmul %25, %24, %cst_20 {dimension_numbers = #tpu.dot_dimension_numbers<[1], [0], [0], [1], [0, 0, 1, 1], [], []>} : vector<8x128xf32>, vector<128x512xf32>, vector<8x512xf32> -> vector<8x512xf32>
    %c0_21 = arith.constant 0 : index
    %c0_22 = arith.constant 0 : index
    %28 = vector.load %arg12[%c0_21, %c0_22] : memref<64x512xf32, #tpu.memory_space<vmem>>, vector<8x512xf32>
    %29 = arith.addf %27, %28 : vector<8x512xf32>
    %30 = vector.extract_strided_slice %29 {offsets = [0, 0], sizes = [8, 384], strides = [1, 1]} : vector<8x512xf32> to vector<8x384xf32>
    %31 = arith.negf %30 : vector<8x384xf32>
    %32 = math.exp %31 : vector<8x384xf32>
    %cst_23 = arith.constant 1.000000e+00 : f32
    %33 = vector.broadcast %cst_23 : f32 to vector<8x384xf32>
    %34 = arith.addf %33, %32 : vector<8x384xf32>
    %35 = arith.divf %33, %34 : vector<8x384xf32>
    %36 = vector.extract_strided_slice %29 {offsets = [0, 384], sizes = [8, 128], strides = [1, 1]} : vector<8x512xf32> to vector<8x128xf32>
    %37 = math.tanh %36 : vector<8x128xf32>
    %38 = vector.extract_strided_slice %35 {offsets = [0, 128], sizes = [8, 128], strides = [1, 1]} : vector<8x384xf32> to vector<8x128xf32>
    %39 = arith.mulf %38, %26 : vector<8x128xf32>
    %40 = vector.extract_strided_slice %35 {offsets = [0, 0], sizes = [8, 128], strides = [1, 1]} : vector<8x384xf32> to vector<8x128xf32>
    %41 = arith.mulf %40, %37 : vector<8x128xf32>
    %42 = arith.addf %39, %41 : vector<8x128xf32>
    %43 = vector.extract_strided_slice %35 {offsets = [0, 256], sizes = [8, 128], strides = [1, 1]} : vector<8x384xf32> to vector<8x128xf32>
    %44 = math.tanh %42 : vector<8x128xf32>
    %45 = arith.mulf %43, %44 : vector<8x128xf32>
    %c0_24 = arith.constant 0 : index
    %c0_25 = arith.constant 0 : index
    %46 = vector.load %arg13[%c0_24, %c0_25] : memref<64x128xf32, #tpu.memory_space<vmem>>, vector<8x128xf32>
    tpu.vector_store %arg13[%c0_24, %c0_25], %45 {strides = array<i32>} : memref<64x128xf32, #tpu.memory_space<vmem>>, vector<8x128xf32>,
    %c56 = arith.constant 56 : index
    %c0_26 = arith.constant 0 : index
    %47 = vector.load %arg14[%c56, %c0_26] : memref<64x128xf32, #tpu.memory_space<vmem>>, vector<8x128xf32>
    tpu.vector_store %arg14[%c56, %c0_26], %45 {strides = array<i32>} : memref<64x128xf32, #tpu.memory_space<vmem>>, vector<8x128xf32>,
    %cst_27 = arith.constant dense<0.000000e+00> : vector<8x512xf32>
    %48 = tpu.matmul %45, %24, %cst_27 {dimension_numbers = #tpu.dot_dimension_numbers<[1], [0], [0], [1], [0, 0, 1, 1], [], []>} : vector<8x128xf32>, vector<128x512xf32>, vector<8x512xf32> -> vector<8x512xf32>
    %c8 = arith.constant 8 : index
    %c0_28 = arith.constant 0 : index
    %49 = vector.load %arg12[%c8, %c0_28] : memref<64x512xf32, #tpu.memory_space<vmem>>, vector<8x512xf32>
    %50 = arith.addf %48, %49 : vector<8x512xf32>
    %51 = vector.extract_strided_slice %50 {offsets = [0, 0], sizes = [8, 384], strides = [1, 1]} : vector<8x512xf32> to vector<8x384xf32>
    %52 = arith.negf %51 : vector<8x384xf32>
    %53 = math.exp %52 : vector<8x384xf32>
    %cst_29 = arith.constant 1.000000e+00 : f32
    %54 = vector.broadcast %cst_29 : f32 to vector<8x384xf32>
    %55 = arith.addf %54, %53 : vector<8x384xf32>
    %56 = arith.divf %54, %55 : vector<8x384xf32>
    %57 = vector.extract_strided_slice %50 {offsets = [0, 384], sizes = [8, 128], strides = [1, 1]} : vector<8x512xf32> to vector<8x128xf32>
    %58 = math.tanh %57 : vector<8x128xf32>
    %59 = vector.extract_strided_slice %56 {offsets = [0, 128], sizes = [8, 128], strides = [1, 1]} : vector<8x384xf32> to vector<8x128xf32>
    %60 = arith.mulf %59, %42 : vector<8x128xf32>
    %61 = vector.extract_strided_slice %56 {offsets = [0, 0], sizes = [8, 128], strides = [1, 1]} : vector<8x384xf32> to vector<8x128xf32>
    %62 = arith.mulf %61, %58 : vector<8x128xf32>
    %63 = arith.addf %60, %62 : vector<8x128xf32>
    %64 = vector.extract_strided_slice %56 {offsets = [0, 256], sizes = [8, 128], strides = [1, 1]} : vector<8x384xf32> to vector<8x128xf32>
    %65 = math.tanh %63 : vector<8x128xf32>
    %66 = arith.mulf %64, %65 : vector<8x128xf32>
    %c8_30 = arith.constant 8 : index
    %c0_31 = arith.constant 0 : index
    %67 = vector.load %arg13[%c8_30, %c0_31] : memref<64x128xf32, #tpu.memory_space<vmem>>, vector<8x128xf32>
    tpu.vector_store %arg13[%c8_30, %c0_31], %66 {strides = array<i32>} : memref<64x128xf32, #tpu.memory_space<vmem>>, vector<8x128xf32>,
    %c48 = arith.constant 48 : index
    %c0_32 = arith.constant 0 : index
    %68 = vector.load %arg14[%c48, %c0_32] : memref<64x128xf32, #tpu.memory_space<vmem>>, vector<8x128xf32>
    tpu.vector_store %arg14[%c48, %c0_32], %66 {strides = array<i32>} : memref<64x128xf32, #tpu.memory_space<vmem>>, vector<8x128xf32>,
    %cst_33 = arith.constant dense<0.000000e+00> : vector<8x512xf32>
    %69 = tpu.matmul %66, %24, %cst_33 {dimension_numbers = #tpu.dot_dimension_numbers<[1], [0], [0], [1], [0, 0, 1, 1], [], []>} : vector<8x128xf32>, vector<128x512xf32>, vector<8x512xf32> -> vector<8x512xf32>
    %c16 = arith.constant 16 : index
    %c0_34 = arith.constant 0 : index
    %70 = vector.load %arg12[%c16, %c0_34] : memref<64x512xf32, #tpu.memory_space<vmem>>, vector<8x512xf32>
    %71 = arith.addf %69, %70 : vector<8x512xf32>
    %72 = vector.extract_strided_slice %71 {offsets = [0, 0], sizes = [8, 384], strides = [1, 1]} : vector<8x512xf32> to vector<8x384xf32>
    %73 = arith.negf %72 : vector<8x384xf32>
    %74 = math.exp %73 : vector<8x384xf32>
    %cst_35 = arith.constant 1.000000e+00 : f32
    %75 = vector.broadcast %cst_35 : f32 to vector<8x384xf32>
    %76 = arith.addf %75, %74 : vector<8x384xf32>
    %77 = arith.divf %75, %76 : vector<8x384xf32>
    %78 = vector.extract_strided_slice %71 {offsets = [0, 384], sizes = [8, 128], strides = [1, 1]} : vector<8x512xf32> to vector<8x128xf32>
    %79 = math.tanh %78 : vector<8x128xf32>
    %80 = vector.extract_strided_slice %77 {offsets = [0, 128], sizes = [8, 128], strides = [1, 1]} : vector<8x384xf32> to vector<8x128xf32>
    %81 = arith.mulf %80, %63 : vector<8x128xf32>
    %82 = vector.extract_strided_slice %77 {offsets = [0, 0], sizes = [8, 128], strides = [1, 1]} : vector<8x384xf32> to vector<8x128xf32>
    %83 = arith.mulf %82, %79 : vector<8x128xf32>
    %84 = arith.addf %81, %83 : vector<8x128xf32>
    %85 = vector.extract_strided_slice %77 {offsets = [0, 256], sizes = [8, 128], strides = [1, 1]} : vector<8x384xf32> to vector<8x128xf32>
    %86 = math.tanh %84 : vector<8x128xf32>
    %87 = arith.mulf %85, %86 : vector<8x128xf32>
    %c16_36 = arith.constant 16 : index
    %c0_37 = arith.constant 0 : index
    %88 = vector.load %arg13[%c16_36, %c0_37] : memref<64x128xf32, #tpu.memory_space<vmem>>, vector<8x128xf32>
    tpu.vector_store %arg13[%c16_36, %c0_37], %87 {strides = array<i32>} : memref<64x128xf32, #tpu.memory_space<vmem>>, vector<8x128xf32>,
    %c40 = arith.constant 40 : index
    %c0_38 = arith.constant 0 : index
    %89 = vector.load %arg14[%c40, %c0_38] : memref<64x128xf32, #tpu.memory_space<vmem>>, vector<8x128xf32>
    tpu.vector_store %arg14[%c40, %c0_38], %87 {strides = array<i32>} : memref<64x128xf32, #tpu.memory_space<vmem>>, vector<8x128xf32>,
    %cst_39 = arith.constant dense<0.000000e+00> : vector<8x512xf32>
    %90 = tpu.matmul %87, %24, %cst_39 {dimension_numbers = #tpu.dot_dimension_numbers<[1], [0], [0], [1], [0, 0, 1, 1], [], []>} : vector<8x128xf32>, vector<128x512xf32>, vector<8x512xf32> -> vector<8x512xf32>
    %c24 = arith.constant 24 : index
    %c0_40 = arith.constant 0 : index
    %91 = vector.load %arg12[%c24, %c0_40] : memref<64x512xf32, #tpu.memory_space<vmem>>, vector<8x512xf32>
    %92 = arith.addf %90, %91 : vector<8x512xf32>
    %93 = vector.extract_strided_slice %92 {offsets = [0, 0], sizes = [8, 384], strides = [1, 1]} : vector<8x512xf32> to vector<8x384xf32>
    %94 = arith.negf %93 : vector<8x384xf32>
    %95 = math.exp %94 : vector<8x384xf32>
    %cst_41 = arith.constant 1.000000e+00 : f32
    %96 = vector.broadcast %cst_41 : f32 to vector<8x384xf32>
    %97 = arith.addf %96, %95 : vector<8x384xf32>
    %98 = arith.divf %96, %97 : vector<8x384xf32>
    %99 = vector.extract_strided_slice %92 {offsets = [0, 384], sizes = [8, 128], strides = [1, 1]} : vector<8x512xf32> to vector<8x128xf32>
    %100 = math.tanh %99 : vector<8x128xf32>
    %101 = vector.extract_strided_slice %98 {offsets = [0, 128], sizes = [8, 128], strides = [1, 1]} : vector<8x384xf32> to vector<8x128xf32>
    %102 = arith.mulf %101, %84 : vector<8x128xf32>
    %103 = vector.extract_strided_slice %98 {offsets = [0, 0], sizes = [8, 128], strides = [1, 1]} : vector<8x384xf32> to vector<8x128xf32>
    %104 = arith.mulf %103, %100 : vector<8x128xf32>
    %105 = arith.addf %102, %104 : vector<8x128xf32>
    %106 = vector.extract_strided_slice %98 {offsets = [0, 256], sizes = [8, 128], strides = [1, 1]} : vector<8x384xf32> to vector<8x128xf32>
    %107 = math.tanh %105 : vector<8x128xf32>
    %108 = arith.mulf %106, %107 : vector<8x128xf32>
    %c24_42 = arith.constant 24 : index
    %c0_43 = arith.constant 0 : index
    %109 = vector.load %arg13[%c24_42, %c0_43] : memref<64x128xf32, #tpu.memory_space<vmem>>, vector<8x128xf32>
    tpu.vector_store %arg13[%c24_42, %c0_43], %108 {strides = array<i32>} : memref<64x128xf32, #tpu.memory_space<vmem>>, vector<8x128xf32>,
    %c32 = arith.constant 32 : index
    %c0_44 = arith.constant 0 : index
    %110 = vector.load %arg14[%c32, %c0_44] : memref<64x128xf32, #tpu.memory_space<vmem>>, vector<8x128xf32>
    tpu.vector_store %arg14[%c32, %c0_44], %108 {strides = array<i32>} : memref<64x128xf32, #tpu.memory_space<vmem>>, vector<8x128xf32>,
    %cst_45 = arith.constant dense<0.000000e+00> : vector<8x512xf32>
    %111 = tpu.matmul %108, %24, %cst_45 {dimension_numbers = #tpu.dot_dimension_numbers<[1], [0], [0], [1], [0, 0, 1, 1], [], []>} : vector<8x128xf32>, vector<128x512xf32>, vector<8x512xf32> -> vector<8x512xf32>
    %c32_46 = arith.constant 32 : index
    %c0_47 = arith.constant 0 : index
    %112 = vector.load %arg12[%c32_46, %c0_47] : memref<64x512xf32, #tpu.memory_space<vmem>>, vector<8x512xf32>
    %113 = arith.addf %111, %112 : vector<8x512xf32>
    %114 = vector.extract_strided_slice %113 {offsets = [0, 0], sizes = [8, 384], strides = [1, 1]} : vector<8x512xf32> to vector<8x384xf32>
    %115 = arith.negf %114 : vector<8x384xf32>
    %116 = math.exp %115 : vector<8x384xf32>
    %cst_48 = arith.constant 1.000000e+00 : f32
    %117 = vector.broadcast %cst_48 : f32 to vector<8x384xf32>
    %118 = arith.addf %117, %116 : vector<8x384xf32>
    %119 = arith.divf %117, %118 : vector<8x384xf32>
    %120 = vector.extract_strided_slice %113 {offsets = [0, 384], sizes = [8, 128], strides = [1, 1]} : vector<8x512xf32> to vector<8x128xf32>
    %121 = math.tanh %120 : vector<8x128xf32>
    %122 = vector.extract_strided_slice %119 {offsets = [0, 128], sizes = [8, 128], strides = [1, 1]} : vector<8x384xf32> to vector<8x128xf32>
    %123 = arith.mulf %122, %105 : vector<8x128xf32>
    %124 = vector.extract_strided_slice %119 {offsets = [0, 0], sizes = [8, 128], strides = [1, 1]} : vector<8x384xf32> to vector<8x128xf32>
    %125 = arith.mulf %124, %121 : vector<8x128xf32>
    %126 = arith.addf %123, %125 : vector<8x128xf32>
    %127 = vector.extract_strided_slice %119 {offsets = [0, 256], sizes = [8, 128], strides = [1, 1]} : vector<8x384xf32> to vector<8x128xf32>
    %128 = math.tanh %126 : vector<8x128xf32>
    %129 = arith.mulf %127, %128 : vector<8x128xf32>
    %c32_49 = arith.constant 32 : index
    %c0_50 = arith.constant 0 : index
    %130 = vector.load %arg13[%c32_49, %c0_50] : memref<64x128xf32, #tpu.memory_space<vmem>>, vector<8x128xf32>
    tpu.vector_store %arg13[%c32_49, %c0_50], %129 {strides = array<i32>} : memref<64x128xf32, #tpu.memory_space<vmem>>, vector<8x128xf32>,
    %c24_51 = arith.constant 24 : index
    %c0_52 = arith.constant 0 : index
    %131 = vector.load %arg14[%c24_51, %c0_52] : memref<64x128xf32, #tpu.memory_space<vmem>>, vector<8x128xf32>
    tpu.vector_store %arg14[%c24_51, %c0_52], %129 {strides = array<i32>} : memref<64x128xf32, #tpu.memory_space<vmem>>, vector<8x128xf32>,
    %cst_53 = arith.constant dense<0.000000e+00> : vector<8x512xf32>
    %132 = tpu.matmul %129, %24, %cst_53 {dimension_numbers = #tpu.dot_dimension_numbers<[1], [0], [0], [1], [0, 0, 1, 1], [], []>} : vector<8x128xf32>, vector<128x512xf32>, vector<8x512xf32> -> vector<8x512xf32>
    %c40_54 = arith.constant 40 : index
    %c0_55 = arith.constant 0 : index
    %133 = vector.load %arg12[%c40_54, %c0_55] : memref<64x512xf32, #tpu.memory_space<vmem>>, vector<8x512xf32>
    %134 = arith.addf %132, %133 : vector<8x512xf32>
    %135 = vector.extract_strided_slice %134 {offsets = [0, 0], sizes = [8, 384], strides = [1, 1]} : vector<8x512xf32> to vector<8x384xf32>
    %136 = arith.negf %135 : vector<8x384xf32>
    %137 = math.exp %136 : vector<8x384xf32>
    %cst_56 = arith.constant 1.000000e+00 : f32
    %138 = vector.broadcast %cst_56 : f32 to vector<8x384xf32>
    %139 = arith.addf %138, %137 : vector<8x384xf32>
    %140 = arith.divf %138, %139 : vector<8x384xf32>
    %141 = vector.extract_strided_slice %134 {offsets = [0, 384], sizes = [8, 128], strides = [1, 1]} : vector<8x512xf32> to vector<8x128xf32>
    %142 = math.tanh %141 : vector<8x128xf32>
    %143 = vector.extract_strided_slice %140 {offsets = [0, 128], sizes = [8, 128], strides = [1, 1]} : vector<8x384xf32> to vector<8x128xf32>
    %144 = arith.mulf %143, %126 : vector<8x128xf32>
    %145 = vector.extract_strided_slice %140 {offsets = [0, 0], sizes = [8, 128], strides = [1, 1]} : vector<8x384xf32> to vector<8x128xf32>
    %146 = arith.mulf %145, %142 : vector<8x128xf32>
    %147 = arith.addf %144, %146 : vector<8x128xf32>
    %148 = vector.extract_strided_slice %140 {offsets = [0, 256], sizes = [8, 128], strides = [1, 1]} : vector<8x384xf32> to vector<8x128xf32>
    %149 = math.tanh %147 : vector<8x128xf32>
    %150 = arith.mulf %148, %149 : vector<8x128xf32>
    %c40_57 = arith.constant 40 : index
    %c0_58 = arith.constant 0 : index
    %151 = vector.load %arg13[%c40_57, %c0_58] : memref<64x128xf32, #tpu.memory_space<vmem>>, vector<8x128xf32>
    tpu.vector_store %arg13[%c40_57, %c0_58], %150 {strides = array<i32>} : memref<64x128xf32, #tpu.memory_space<vmem>>, vector<8x128xf32>,
    %c16_59 = arith.constant 16 : index
    %c0_60 = arith.constant 0 : index
    %152 = vector.load %arg14[%c16_59, %c0_60] : memref<64x128xf32, #tpu.memory_space<vmem>>, vector<8x128xf32>
    tpu.vector_store %arg14[%c16_59, %c0_60], %150 {strides = array<i32>} : memref<64x128xf32, #tpu.memory_space<vmem>>, vector<8x128xf32>,
    %cst_61 = arith.constant dense<0.000000e+00> : vector<8x512xf32>
    %153 = tpu.matmul %150, %24, %cst_61 {dimension_numbers = #tpu.dot_dimension_numbers<[1], [0], [0], [1], [0, 0, 1, 1], [], []>} : vector<8x128xf32>, vector<128x512xf32>, vector<8x512xf32> -> vector<8x512xf32>
    %c48_62 = arith.constant 48 : index
    %c0_63 = arith.constant 0 : index
    %154 = vector.load %arg12[%c48_62, %c0_63] : memref<64x512xf32, #tpu.memory_space<vmem>>, vector<8x512xf32>
    %155 = arith.addf %153, %154 : vector<8x512xf32>
    %156 = vector.extract_strided_slice %155 {offsets = [0, 0], sizes = [8, 384], strides = [1, 1]} : vector<8x512xf32> to vector<8x384xf32>
    %157 = arith.negf %156 : vector<8x384xf32>
    %158 = math.exp %157 : vector<8x384xf32>
    %cst_64 = arith.constant 1.000000e+00 : f32
    %159 = vector.broadcast %cst_64 : f32 to vector<8x384xf32>
    %160 = arith.addf %159, %158 : vector<8x384xf32>
    %161 = arith.divf %159, %160 : vector<8x384xf32>
    %162 = vector.extract_strided_slice %155 {offsets = [0, 384], sizes = [8, 128], strides = [1, 1]} : vector<8x512xf32> to vector<8x128xf32>
    %163 = math.tanh %162 : vector<8x128xf32>
    %164 = vector.extract_strided_slice %161 {offsets = [0, 128], sizes = [8, 128], strides = [1, 1]} : vector<8x384xf32> to vector<8x128xf32>
    %165 = arith.mulf %164, %147 : vector<8x128xf32>
    %166 = vector.extract_strided_slice %161 {offsets = [0, 0], sizes = [8, 128], strides = [1, 1]} : vector<8x384xf32> to vector<8x128xf32>
    %167 = arith.mulf %166, %163 : vector<8x128xf32>
    %168 = arith.addf %165, %167 : vector<8x128xf32>
    %169 = vector.extract_strided_slice %161 {offsets = [0, 256], sizes = [8, 128], strides = [1, 1]} : vector<8x384xf32> to vector<8x128xf32>
    %170 = math.tanh %168 : vector<8x128xf32>
    %171 = arith.mulf %169, %170 : vector<8x128xf32>
    %c48_65 = arith.constant 48 : index
    %c0_66 = arith.constant 0 : index
    %172 = vector.load %arg13[%c48_65, %c0_66] : memref<64x128xf32, #tpu.memory_space<vmem>>, vector<8x128xf32>
    tpu.vector_store %arg13[%c48_65, %c0_66], %171 {strides = array<i32>} : memref<64x128xf32, #tpu.memory_space<vmem>>, vector<8x128xf32>,
    %c8_67 = arith.constant 8 : index
    %c0_68 = arith.constant 0 : index
    %173 = vector.load %arg14[%c8_67, %c0_68] : memref<64x128xf32, #tpu.memory_space<vmem>>, vector<8x128xf32>
    tpu.vector_store %arg14[%c8_67, %c0_68], %171 {strides = array<i32>} : memref<64x128xf32, #tpu.memory_space<vmem>>, vector<8x128xf32>,
    %cst_69 = arith.constant dense<0.000000e+00> : vector<8x512xf32>
    %174 = tpu.matmul %171, %24, %cst_69 {dimension_numbers = #tpu.dot_dimension_numbers<[1], [0], [0], [1], [0, 0, 1, 1], [], []>} : vector<8x128xf32>, vector<128x512xf32>, vector<8x512xf32> -> vector<8x512xf32>
    %c56_70 = arith.constant 56 : index
    %c0_71 = arith.constant 0 : index
    %175 = vector.load %arg12[%c56_70, %c0_71] : memref<64x512xf32, #tpu.memory_space<vmem>>, vector<8x512xf32>
    %176 = arith.addf %174, %175 : vector<8x512xf32>
    %177 = vector.extract_strided_slice %176 {offsets = [0, 0], sizes = [8, 384], strides = [1, 1]} : vector<8x512xf32> to vector<8x384xf32>
    %178 = arith.negf %177 : vector<8x384xf32>
    %179 = math.exp %178 : vector<8x384xf32>
    %cst_72 = arith.constant 1.000000e+00 : f32
    %180 = vector.broadcast %cst_72 : f32 to vector<8x384xf32>
    %181 = arith.addf %180, %179 : vector<8x384xf32>
    %182 = arith.divf %180, %181 : vector<8x384xf32>
    %183 = vector.extract_strided_slice %176 {offsets = [0, 384], sizes = [8, 128], strides = [1, 1]} : vector<8x512xf32> to vector<8x128xf32>
    %184 = math.tanh %183 : vector<8x128xf32>
    %185 = vector.extract_strided_slice %182 {offsets = [0, 128], sizes = [8, 128], strides = [1, 1]} : vector<8x384xf32> to vector<8x128xf32>
    %186 = arith.mulf %185, %168 : vector<8x128xf32>
    %187 = vector.extract_strided_slice %182 {offsets = [0, 0], sizes = [8, 128], strides = [1, 1]} : vector<8x384xf32> to vector<8x128xf32>
    %188 = arith.mulf %187, %184 : vector<8x128xf32>
    %189 = arith.addf %186, %188 : vector<8x128xf32>
    %190 = vector.extract_strided_slice %182 {offsets = [0, 256], sizes = [8, 128], strides = [1, 1]} : vector<8x384xf32> to vector<8x128xf32>
    %191 = math.tanh %189 : vector<8x128xf32>
    %192 = arith.mulf %190, %191 : vector<8x128xf32>
    %c56_73 = arith.constant 56 : index
    %c0_74 = arith.constant 0 : index
    %193 = vector.load %arg13[%c56_73, %c0_74] : memref<64x128xf32, #tpu.memory_space<vmem>>, vector<8x128xf32>
    tpu.vector_store %arg13[%c56_73, %c0_74], %192 {strides = array<i32>} : memref<64x128xf32, #tpu.memory_space<vmem>>, vector<8x128xf32>,
    %c0_75 = arith.constant 0 : index
    %c0_76 = arith.constant 0 : index
    %194 = vector.load %arg14[%c0_75, %c0_76] : memref<64x128xf32, #tpu.memory_space<vmem>>, vector<8x128xf32>
    tpu.vector_store %arg14[%c0_75, %c0_76], %192 {strides = array<i32>} : memref<64x128xf32, #tpu.memory_space<vmem>>, vector<8x128xf32>,
    %c0_77 = arith.constant 0 : index
    %c0_78 = arith.constant 0 : index
    %195 = vector.load %arg13[%c0_77, %c0_78] : memref<64x128xf32, #tpu.memory_space<vmem>>, vector<64x128xf32>
    %c0_79 = arith.constant 0 : index
    %c0_80 = arith.constant 0 : index
    %196 = vector.load %arg8[%c0_79, %c0_80] : memref<128x128xf32, #tpu.memory_space<vmem>>, vector<128x128xf32>
    %cst_81 = arith.constant dense<0.000000e+00> : vector<64x128xf32>
    %197 = tpu.matmul %195, %196, %cst_81 {dimension_numbers = #tpu.dot_dimension_numbers<[1], [0], [0], [1], [0, 0, 1, 1], [], []>} : vector<64x128xf32>, vector<128x128xf32>, vector<64x128xf32> -> vector<64x128xf32>
    %c0_82 = arith.constant 0 : index
    %c0_83 = arith.constant 0 : index
    %198 = vector.load %arg14[%c0_82, %c0_83] : memref<64x128xf32, #tpu.memory_space<vmem>>, vector<64x128xf32>
    %c0_84 = arith.constant 0 : index
    %c0_85 = arith.constant 0 : index
    %199 = vector.load %arg9[%c0_84, %c0_85] : memref<128x128xf32, #tpu.memory_space<vmem>>, vector<128x128xf32>
    %cst_86 = arith.constant dense<0.000000e+00> : vector<64x128xf32>
    %200 = tpu.matmul %198, %199, %cst_86 {dimension_numbers = #tpu.dot_dimension_numbers<[1], [0], [0], [1], [0, 0, 1, 1], [], []>} : vector<64x128xf32>, vector<128x128xf32>, vector<64x128xf32> -> vector<64x128xf32>
    %201 = arith.addf %197, %200 : vector<64x128xf32>
    %c0_87 = arith.constant 0 : index
    %c0_88 = arith.constant 0 : index
    %202 = vector.load %arg10[%c0_87, %c0_88] : memref<1x128xf32, #tpu.memory_space<vmem>>, vector<1x128xf32>
    %203 = vector.broadcast %202 : vector<1x128xf32> to vector<64x128xf32>
    %204 = arith.addf %201, %203 : vector<64x128xf32>
    %c0_89 = arith.constant 0 : index
    %c0_90 = arith.constant 0 : index
    %c0_91 = arith.constant 0 : index
    %205 = vector.load %arg11[%c0_89, %c0_90, %c0_91] : memref<1x64x128xf32, #tpu.memory_space<vmem>>, vector<1x64x128xf32>
    %206 = vector.shape_cast %205 : vector<1x64x128xf32> to vector<64x128xf32>
    %207 = vector.shape_cast %204 : vector<64x128xf32> to vector<1x64x128xf32>
    tpu.vector_store %arg11[%c0_89, %c0_90, %c0_91], %207 {strides = array<i32>} : memref<1x64x128xf32, #tpu.memory_space<vmem>>, vector<1x64x128xf32>,
    return
  }
  func.func @transform_0(%arg0: i32) -> (i32, i32, i32) {
    %c0_i32 = arith.constant 0 : i32
    %c0_i32_0 = arith.constant 0 : i32
    %c0_i32_1 = arith.constant 0 : i32
    return %arg0, %c0_i32, %c0_i32_0 : i32, i32, i32
  }
  func.func @transform_1(%arg0: i32) -> (i32, i32, i32) {
    %c0_i32 = arith.constant 0 : i32
    %c0_i32_0 = arith.constant 0 : i32
    %c0_i32_1 = arith.constant 0 : i32
    return %arg0, %c0_i32, %c0_i32_0 : i32, i32, i32
  }
  func.func @transform_2(%arg0: i32) -> (i32, i32) {
    %c0_i32 = arith.constant 0 : i32
    %c0_i32_0 = arith.constant 0 : i32
    %c0_i32_1 = arith.constant 0 : i32
    return %c0_i32, %c0_i32_0 : i32, i32
  }
  func.func @transform_3(%arg0: i32) -> (i32, i32) {
    %c0_i32 = arith.constant 0 : i32
    %c0_i32_0 = arith.constant 0 : i32
    %c0_i32_1 = arith.constant 0 : i32
    return %c0_i32, %c0_i32_0 : i32, i32
  }
  func.func @transform_4(%arg0: i32) -> (i32, i32) {
    %c0_i32 = arith.constant 0 : i32
    %c0_i32_0 = arith.constant 0 : i32
    %c0_i32_1 = arith.constant 0 : i32
    return %c0_i32, %c0_i32_0 : i32, i32
  }
  func.func @transform_5(%arg0: i32) -> (i32, i32) {
    %c0_i32 = arith.constant 0 : i32
    %c0_i32_0 = arith.constant 0 : i32
    %c0_i32_1 = arith.constant 0 : i32
    return %c0_i32, %c0_i32_0 : i32, i32
  }
  func.func @transform_6(%arg0: i32) -> (i32, i32) {
    %c0_i32 = arith.constant 0 : i32
    %c0_i32_0 = arith.constant 0 : i32
    %c0_i32_1 = arith.constant 0 : i32
    return %c0_i32, %c0_i32_0 : i32, i32
  }
  func.func @transform_7(%arg0: i32) -> (i32, i32) {
    %c0_i32 = arith.constant 0 : i32
    %c0_i32_0 = arith.constant 0 : i32
    %c0_i32_1 = arith.constant 0 : i32
    return %c0_i32, %c0_i32_0 : i32, i32
  }
  func.func @transform_8(%arg0: i32) -> (i32, i32) {
    %c0_i32 = arith.constant 0 : i32
    %c0_i32_0 = arith.constant 0 : i32
    %c0_i32_1 = arith.constant 0 : i32
    return %c0_i32, %c0_i32_0 : i32, i32
  }
  func.func @transform_9(%arg0: i32) -> (i32, i32) {
    %c0_i32 = arith.constant 0 : i32
    %c0_i32_0 = arith.constant 0 : i32
    %c0_i32_1 = arith.constant 0 : i32
    return %c0_i32, %c0_i32_0 : i32, i32
  }
  func.func @transform_10(%arg0: i32) -> (i32, i32, i32) {
    %c0_i32 = arith.constant 0 : i32
    %c0_i32_0 = arith.constant 0 : i32
    %c0_i32_1 = arith.constant 0 : i32
    return %arg0, %c0_i32, %c0_i32_0 : i32, i32, i32
  }
}

</mosaic_0001>

<bundles_post_ra>
// kernel: tpu_custom_call.1
= control target key start
LH: loop header
LB: loop body
LE: loop exit
PB: predicated region body
PF: predicated region fallthrough
CT: control target
= control target key end

     0   :  { %15 = vsyncpa [#allocation6], 0  ;;  %s4121_s0 = inlined_call_operand.vmem [shape: f32[1,64,16], index: 0, kind: input, shape index: {}]   ;;  %s4122_s1 = inlined_call_operand.vmem [shape: f32[1,64,16], index: 1, kind: input, shape index: {}]   ;;  %s4123_s2 = inlined_call_operand.vmem [shape: f32[16,256], index: 2, kind: input, shape index: {}]   ;;  %s4124_s3 = inlined_call_operand.hbm [shape: f32[16,256], index: 3, kind: input, shape index: {}]   ;;  %s4125_s4 = inlined_call_operand.vmem [shape: f32[1,256], index: 4, kind: input, shape index: {}]   ;;  %s4126_s5 = inlined_call_operand.vmem [shape: f32[1,256], index: 5, kind: input, shape index: {}]   ;;  %s4127_s6 = inlined_call_operand.hbm [shape: f32[128,512], index: 6, kind: input, shape index: {}]   ;;  %s4128_s7 = inlined_call_operand.vmem [shape: f32[128,128], index: 7, kind: input, shape index: {}]   ;;  %s4129_s8 = inlined_call_operand.hbm [shape: f32[128,128], index: 8, kind: input, shape index: {}]   ;;  %s4130_s9 = inlined_call_operand.vmem [shape: f32[1,128], index: 9, kind: input, shape index: {}]   ;;  %s4131_s10 = inlined_call_operand.hbm [shape: f32[1,64,128], index: 10, kind: output, shape index: {}]  }
   0x1   :  { %16 = vsyncpa [#allocation9], 0 }
   0x2   :  { %17 = vsyncpa [#allocation7], 0  ;;  %s2799_s13 = smov [#allocation8]  }
   0x3   :  { %s45_s14 = sshll.u32 %s2799_s13, 4  ;;  %s46_s14 = int_to_ptr.vmem [resolvable:$true] %s45_s14 }
   0x4   :  { %s2721_s15 = scalar_lea.vmem %s46_s14, 8192  ;;  %p2726_p1 = scmp.lt.s32.totalorder %s46_s14, %s46_s14 }
   0x5   :  { %p2722_p0 = scmp.ne.s32.totalorder %s46_s14, %s2721_s15  ;;  %p2727_p2 = scmp.lt.s32.totalorder %s2721_s15, %s2721_s15 }
   0x7   :  { %p2728_p3 = por %p2727_p2, %p2726_p1 }
   0x9   :  { %p2729_p4 = pnand %p2728_p3, %p2722_p0 }
   0xb   :  { %2732 = shalt.err (!%p2729_p4)
}
   0xc   :  { %s2800_s16 = smov 512   ;;  %s2801_s17 = smov 32  }
   0xd   :  { %51 = dma.hbm_to_vmem [thread:$0]  %s4127_s6, 8192, %s46_s14, [#allocation9], %s2800_s16, %s2800_s16, %s2801_s17  }
   0xe   :  { %s2802_s20 = smov [#allocation5]  }
   0xf   :  { %s29_s21 = sshll.u32 %s2802_s20, 4  ;;  %s30_s21 = int_to_ptr.vmem [resolvable:$true] %s29_s21 }
  0x10   :  { %s2741_s22 = scalar_lea.vmem %s30_s21, 512  ;;  %p2746_p6 = scmp.lt.s32.totalorder %s30_s21, %s30_s21 }
  0x11   :  { %p2742_p5 = scmp.ne.s32.totalorder %s30_s21, %s2741_s22  ;;  %p2747_p7 = scmp.lt.s32.totalorder %s2741_s22, %s2741_s22 }
  0x13   :  { %p2748_p8 = por %p2747_p7, %p2746_p6 }
  0x15   :  { %p2749_p9 = pnand %p2748_p8, %p2742_p5 }
  0x17   :  { %2752 = shalt.err (!%p2749_p9)
}
  0x18   :  { %s2803_s23 = smov 256   ;;  %s2804_s24 = smov 16  }
  0x19   :  { %35 = dma.hbm_to_vmem [thread:$0]  %s4124_s3, 512, %s30_s21, [#allocation6], %s2803_s23, %s2803_s23, %s2804_s24  }
  0x1a   :  { %s2805_s27 = smov [#allocation10]  }
  0x1b   :  { %s59_s28 = sshll.u32 %s2805_s27, 4  ;;  %s60_s28 = int_to_ptr.vmem [resolvable:$true] %s59_s28 }
  0x1c   :  { %s2761_s6 = scalar_lea.vmem %s60_s28, 2048  ;;  %p2766_p11 = scmp.lt.s32.totalorder %s60_s28, %s60_s28 }
  0x1d   :  { %p2762_p10 = scmp.ne.s32.totalorder %s60_s28, %s2761_s6  ;;  %p2767_p12 = scmp.lt.s32.totalorder %s2761_s6, %s2761_s6 }
  0x1f   :  { %p2768_p13 = por %p2767_p12, %p2766_p11 }
  0x21   :  { %p2769_p0 = pnand %p2768_p13, %p2762_p10 }
  0x23   :  { %2772 = shalt.err (!%p2769_p0)
}
  0x24   :  { %s2806_s29 = smov 128   ;;  %s2807_s30 = smov 8  }
  0x25   :  { %65 = dma.hbm_to_vmem [thread:$0]  %s4129_s8, 2048, %s60_s28, [#allocation9], %s2806_s29, %s2806_s29, %s2807_s30  }
  0x26   :  { %2793 = dma.done.wait [#allocation6], 512  }
  0x27   :  { %2794 = vsyncadd [#allocation6], 4294966784 }
  0x28   :  { %2795 = dma.done.wait [#allocation9], 10240  }
  0x29   :  { %2796 = vsyncadd [#allocation9], 4294957056  ;;  %v4134_v0 = vmov 0.0   ;;  %v250_v1 = vld [vmem:[#allocation5 + $0x18] sm:$0xff]  ;;  %v249_v2 = vld [vmem:[#allocation5 + $0x10] sm:$0xff]  ;;  %vm101_vm0 = vcmask 130048  }
  0x2a   :  { %351 = vmatprep.mubr.f32.mxu1 %v4134_v0  ;;  %190 = vmatprep.mubr.f32.mxu0 %v4134_v0  ;;  %v88_v3 = vld [vmem:[%s4123_s2 + $0x18] sm:$0xff]  ;;  %v248_v4 = vld [vmem:[#allocation5 + $0x8] sm:$0xff]  ;;  %v87_v5 = vld [vmem:[%s4123_s2 + $0x10] sm:$0xff]  ;;  %vm528_vm1 = vcmask 523264  }
  0x2b   :  { %315 = vmatprep.subr.mxu1 %v250_v1  ;;  %154 = vmatprep.subr.mxu0 %v88_v3  ;;  %v247_v6 = vld [vmem:[#allocation5] sm:$0xff]  ;;  %v86_v7 = vld [vmem:[%s4123_s2 + $0x8] sm:$0xff]  ;;  %v2914_v15 = vld [vmem:[#allocation8 + $0x1f8] sm:$0xff] }
  0x2c   :  { %316 = vmatpush1.msra.mxu1 %v249_v2  ;;  %155 = vmatpush1.msra.mxu0 %v87_v5  ;;  %v239_v8 = vld [vmem:[%s4122_s1] sm:$0xff]  ;;  %v240_v11 = vld [vmem:[%s4122_s1 + $0x8] sm:$0xff]  ;;  %4256 = vst [vmem:[#allocation16_spill] sm:$0xff] %v2914_v15  ;;  %v2916_v16 = vld [vmem:[#allocation8 + $0x1f0] sm:$0xff] }
  0x2d   :  { %v85_v9 = vld [vmem:[%s4123_s2] sm:$0xff]  ;;  %317 = vmatprep.subr.mxu1 %v248_v4  ;;  %156 = vmatprep.subr.mxu0 %v86_v7  ;;  %v78_v12 = vld [vmem:[%s4121_s0 + $0x8] sm:$0xff]  ;;  %v241_v17 = vld [vmem:[%s4122_s1 + $0x10] sm:$0xff] }
  0x2e   :  { %v77_v10 = vld [vmem:[%s4121_s0] sm:$0xff]  ;;  %318 = vmatpush1.msra.mxu1 %v247_v6  ;;  %157 = vmatpush1.msra.mxu0 %v85_v9  ;;  %v2908_v13 = vld [vmem:[#allocation8 + $0x1e8] sm:$0xff]  ;;  %v79_v18 = vld [vmem:[%s4121_s0 + $0x10] sm:$0xff] }
  0x2f   :  { %2340 = vmatmul.mubr.msk.f32.vlgmr.msra.gmra.mxu1 %vm101_vm0, %v239_v8  ;;  %2332 = vmatmul.mubr.msk.f32.vlgmr.msra.gmra.mxu0 %vm101_vm0, %v77_v10  ;;  %4255 = vst [vmem:[#allocation15_spill] sm:$0xff] %v2908_v13  ;;  %v2912_v14 = vld [vmem:[#allocation8 + $0x1e0] sm:$0xff]  ;;  %v2929_v19 = vld [vmem:[#allocation8 + $0x1c8] sm:$0xff]  ;;  %v2932_v20 = vld [vmem:[#allocation8 + $0x1d8] sm:$0xff] }
  0x30   :  { %357 = vmatprep.mubr.f32.mxu1 %v4134_v0  ;;  %196 = vmatprep.mubr.f32.mxu0 %v4134_v0  ;;  %v2936_v21 = vld [vmem:[#allocation8 + $0x1c0] sm:$0xff]  ;;  %v2938_v22 = vld [vmem:[#allocation8 + $0x1d0] sm:$0xff]  ;;  %v242_v23 = vld [vmem:[%s4122_s1 + $0x18] sm:$0xff] }
  0x31   :  { %661 = vmatprep.subr.mxu0 %v2908_v13  ;;  %732 = vmatprep.subr.mxu1 %v2914_v15  ;;  %v80_v24 = vld [vmem:[%s4121_s0 + $0x18] sm:$0xff]  ;;  %v2951_v25 = vld [vmem:[#allocation8 + $0x1a8] sm:$0xff]  ;;  %v2958_v27 = vld [vmem:[#allocation8 + $0x1a0] sm:$0xff] }
  0x32   :  { %662 = vmatpush1.msra.mxu0 %v2912_v14  ;;  %733 = vmatpush1.msra.mxu1 %v2916_v16  ;;  %v2954_v26 = vld [vmem:[#allocation8 + $0x1b8] sm:$0xff]  ;;  %v2960_v28 = vld [vmem:[#allocation8 + $0x1b0] sm:$0xff]  ;;  %v243_v29 = vld [vmem:[%s4122_s1 + $0x20] sm:$0xff] }
  0x33   :  { %2341 = vmatmul.mubr.msk.f32.gmra.mxu1 %vm101_vm0, %v240_v11  ;;  %2333 = vmatmul.mubr.msk.f32.gmra.mxu0 %vm101_vm0, %v78_v12  ;;  %v81_v30 = vld [vmem:[%s4121_s0 + $0x20] sm:$0xff]  ;;  %v2973_v31 = vld [vmem:[#allocation8 + $0x188] sm:$0xff]  ;;  %v2976_v32 = vld [vmem:[#allocation8 + $0x198] sm:$0xff] }
  0x34   :  { %363 = vmatprep.mubr.f32.mxu1 %v4134_v0  ;;  %202 = vmatprep.mubr.f32.mxu0 %v4134_v0  ;;  %v2980_v33 = vld [vmem:[#allocation8 + $0x180] sm:$0xff]  ;;  %v2982_v34 = vld [vmem:[#allocation8 + $0x190] sm:$0xff]  ;;  %v244_v35 = vld [vmem:[%s4122_s1 + $0x28] sm:$0xff] }
  0x35   :  { %663 = vmatprep.subr.mxu0 %v2929_v19  ;;  %734 = vmatprep.subr.mxu1 %v2932_v20  ;;  %v82_v36 = vld [vmem:[%s4121_s0 + $0x28] sm:$0xff]  ;;  %v2998_v38 = vld [vmem:[#allocation8 + $0x178] sm:$0xff]  ;;  %v3002_v39 = vld [vmem:[#allocation8 + $0x160] sm:$0xff] }
  0x36   :  { %664 = vmatpush1.msra.mxu0 %v2936_v21  ;;  %735 = vmatpush1.msra.mxu1 %v2938_v22  ;;  %v2995_v37 = vld [vmem:[#allocation8 + $0x168] sm:$0xff]  ;;  %v3004_v40 = vld [vmem:[#allocation8 + $0x170] sm:$0xff]  ;;  %v3020_v44 = vld [vmem:[#allocation8 + $0x158] sm:$0xff] }
  0x37   :  { %2342 = vmatmul.mubr.msk.f32.gmra.mxu1 %vm101_vm0, %v241_v17  ;;  %2334 = vmatmul.mubr.msk.f32.gmra.mxu0 %vm101_vm0, %v79_v18  ;;  %v245_v41 = vld [vmem:[%s4122_s1 + $0x30] sm:$0xff]  ;;  %v3017_v43 = vld [vmem:[#allocation8 + $0x148] sm:$0xff]  ;;  %v3024_v45 = vld [vmem:[#allocation8 + $0x140] sm:$0xff] }
  0x38   :  { %369 = vmatprep.mubr.f32.mxu1 %v4134_v0  ;;  %208 = vmatprep.mubr.f32.mxu0 %v4134_v0  ;;  %v83_v42 = vld [vmem:[%s4121_s0 + $0x30] sm:$0xff]  ;;  %v246_v47 = vld [vmem:[%s4122_s1 + $0x38] sm:$0xff]  ;;  %v3037_v49 = vld [vmem:[#allocation8 + $0x128] sm:$0xff] }
  0x39   :  { %665 = vmatprep.subr.mxu0 %v2951_v25  ;;  %736 = vmatprep.subr.mxu1 %v2954_v26  ;;  %v3026_v46 = vld [vmem:[#allocation8 + $0x150] sm:$0xff]  ;;  %v84_v48 = vld [vmem:[%s4121_s0 + $0x38] sm:$0xff]  ;;  %v3043_v51 = vld [vmem:[#allocation8 + $0x120] sm:$0xff] }
  0x3a   :  { %666 = vmatpush1.msra.mxu0 %v2958_v27  ;;  %737 = vmatpush1.msra.mxu1 %v2960_v28  ;;  %v3040_v50 = vld [vmem:[#allocation8 + $0x138] sm:$0xff]  ;;  %v3046_v52 = vld [vmem:[#allocation8 + $0x130] sm:$0xff]  ;;  %v3050_v53 = vld [vmem:[#allocation8 + $0x108] sm:$0xff] }
  0x3b   :  { %2343 = vmatmul.mubr.msk.f32.gmra.mxu1 %vm101_vm0, %v242_v23  ;;  %2335 = vmatmul.mubr.msk.f32.gmra.mxu0 %vm101_vm0, %v80_v24  ;;  %v3052_v54 = vld [vmem:[#allocation8 + $0x118] sm:$0xff]  ;;  %v3056_v55 = vld [vmem:[#allocation8 + $0x100] sm:$0xff]  ;;  %v3058_v56 = vld [vmem:[#allocation8 + $0x110] sm:$0xff] }
  0x3c   :  { %375 = vmatprep.mubr.f32.mxu1 %v4134_v0  ;;  %214 = vmatprep.mubr.f32.mxu0 %v4134_v0  ;;  %v3062_v57 = vld [vmem:[#allocation8 + $0xe8] sm:$0xff]  ;;  %v3064_v58 = vld [vmem:[#allocation8 + $0xf8] sm:$0xff]  ;;  %v3068_v59 = vld [vmem:[#allocation8 + $0xe0] sm:$0xff] }
  0x3d   :  { %667 = vmatprep.subr.mxu0 %v2973_v31  ;;  %738 = vmatprep.subr.mxu1 %v2976_v32  ;;  %v3070_v60 = vld [vmem:[#allocation8 + $0xf0] sm:$0xff]  ;;  %v3074_v61 = vld [vmem:[#allocation8 + $0xc8] sm:$0xff]  ;;  %v3076_v62 = vld [vmem:[#allocation8 + $0xd8] sm:$0xff] }
  0x3e   :  { %668 = vmatpush1.msra.mxu0 %v2980_v33  ;;  %739 = vmatpush1.msra.mxu1 %v2982_v34  ;;  %v3080_v63 = vld [vmem:[#allocation8 + $0xc0] sm:$0xff]  ;;  %v3082_v1 = vld [vmem:[#allocation8 + $0xd0] sm:$0xff]  ;;  %v3086_v2 = vld [vmem:[#allocation8 + $0xa8] sm:$0xff] }
  0x3f   :  { %2344 = vmatmul.mubr.msk.f32.gmra.mxu1 %vm101_vm0, %v243_v29  ;;  %2336 = vmatmul.mubr.msk.f32.gmra.mxu0 %vm101_vm0, %v81_v30  ;;  %v3088_v3 = vld [vmem:[#allocation8 + $0xb8] sm:$0xff]  ;;  %v3092_v4 = vld [vmem:[#allocation8 + $0xa0] sm:$0xff]  ;;  %v3094_v5 = vld [vmem:[#allocation8 + $0xb0] sm:$0xff] }
  0x40   :  { %381 = vmatprep.mubr.f32.mxu1 %v4134_v0  ;;  %220 = vmatprep.mubr.f32.mxu0 %v4134_v0  ;;  %v3098_v6 = vld [vmem:[#allocation8 + $0x88] sm:$0xff]  ;;  %v3100_v7 = vld [vmem:[#allocation8 + $0x98] sm:$0xff]  ;;  %v3104_v8 = vld [vmem:[#allocation8 + $0x80] sm:$0xff] }
  0x41   :  { %669 = vmatprep.subr.mxu0 %v2995_v37  ;;  %740 = vmatprep.subr.mxu1 %v2998_v38  ;;  %4257 = vst [vmem:[#allocation17_spill] sm:$0xff] %v3104_v8  ;;  %v3106_v9 = vld [vmem:[#allocation8 + $0x90] sm:$0xff]  ;;  %v3110_v10 = vld [vmem:[#allocation8 + $0x68] sm:$0xff]  ;;  %v3112_v11 = vld [vmem:[#allocation8 + $0x78] sm:$0xff] }
  0x42   :  { %670 = vmatpush1.msra.mxu0 %v3002_v39  ;;  %741 = vmatpush1.msra.mxu1 %v3004_v40  ;;  %4258 = vst [vmem:[#allocation18_spill] sm:$0xff] %v3106_v9  ;;  %4259 = vst [vmem:[#allocation19_spill] sm:$0xff] %v3110_v10  ;;  %v3116_v12 = vld [vmem:[#allocation8 + $0x60] sm:$0xff]  ;;  %v3118_v17 = vld [vmem:[#allocation8 + $0x70] sm:$0xff] }
  0x43   :  { %2345 = vmatmul.mubr.msk.f32.gmra.mxu1 %vm101_vm0, %v244_v35  ;;  %2337 = vmatmul.mubr.msk.f32.gmra.mxu0 %vm101_vm0, %v82_v36  ;;  %4260 = vst [vmem:[#allocation20_spill] sm:$0xff] %v3112_v11  ;;  %4261 = vst [vmem:[#allocation21_spill] sm:$0xff] %v3116_v12  ;;  %v3122_v18 = vld [vmem:[#allocation8 + $0x48] sm:$0xff]  ;;  %v3124_v23 = vld [vmem:[#allocation8 + $0x58] sm:$0xff] }
  0x44   :  { %387 = vmatprep.mubr.f32.mxu1 %v4134_v0  ;;  %226 = vmatprep.mubr.f32.mxu0 %v4134_v0  ;;  %4262 = vst [vmem:[#allocation22_spill] sm:$0xff] %v3118_v17  ;;  %4263 = vst [vmem:[#allocation23_spill] sm:$0xff] %v3122_v18  ;;  %v3128_v24 = vld [vmem:[#allocation8 + $0x40] sm:$0xff]  ;;  %v3130_v29 = vld [vmem:[#allocation8 + $0x50] sm:$0xff] }
  0x45   :  { %671 = vmatprep.subr.mxu0 %v3017_v43  ;;  %742 = vmatprep.subr.mxu1 %v3020_v44  ;;  %4264 = vst [vmem:[#allocation24_spill] sm:$0xff] %v3124_v23  ;;  %4265 = vst [vmem:[#allocation25_spill] sm:$0xff] %v3128_v24  ;;  %v3134_v30 = vld [vmem:[#allocation8 + $0x28] sm:$0xff]  ;;  %v3136_v35 = vld [vmem:[#allocation8 + $0x38] sm:$0xff] }
  0x46   :  { %672 = vmatpush1.msra.mxu0 %v3024_v45  ;;  %743 = vmatpush1.msra.mxu1 %v3026_v46  ;;  %4266 = vst [vmem:[#allocation26_spill] sm:$0xff] %v3130_v29  ;;  %4267 = vst [vmem:[#allocation27_spill] sm:$0xff] %v3134_v30  ;;  %v3140_v36 = vld [vmem:[#allocation8 + $0x20] sm:$0xff] }
  0x47   :  { %2346 = vmatmul.mubr.msk.f32.gmra.mxu1 %vm101_vm0, %v245_v41  ;;  %2338 = vmatmul.mubr.msk.f32.gmra.mxu0 %vm101_vm0, %v83_v42  ;;  %4268 = vst [vmem:[#allocation28_spill] sm:$0xff] %v3136_v35  ;;  %4269 = vst [vmem:[#allocation29_spill] sm:$0xff] %v3140_v36  ;;  %v3144_v41 = vld [vmem:[#allocation8 + $0x8] sm:$0xff]  ;;  %v3146_v42 = vld [vmem:[#allocation8 + $0x30] sm:$0xff] }
  0x48   :  { %393 = vmatprep.mubr.f32.mxu1 %v4134_v0  ;;  %232 = vmatprep.mubr.f32.mxu0 %v4134_v0  ;;  %4270 = vst [vmem:[#allocation30_spill] sm:$0xff] %v3144_v41  ;;  %4271 = vst [vmem:[#allocation31_spill] sm:$0xff] %v3146_v42 }
  0x49   :  { %673 = vmatprep.subr.mxu0 %v3037_v49  ;;  %744 = vmatprep.subr.mxu1 %v3040_v50 }
  0x4a   :  { %674 = vmatpush1.msra.mxu0 %v3043_v51  ;;  %745 = vmatpush1.msra.mxu1 %v3046_v52 }
  0x4b   :  { %2347 = vmatmul.mubr.msk.f32.gmra.mxu1 %vm101_vm0, %v246_v47  ;;  %2339 = vmatmul.mubr.msk.f32.gmra.mxu0 %vm101_vm0, %v84_v48  ;;  %v3150_v47 = vld [vmem:[#allocation8] sm:$0xff]  ;;  %v3152_v48 = vld [vmem:[#allocation8 + $0x18] sm:$0xff] }
  0x4c   :  { %675 = vmatprep.subr.mxu0 %v3050_v53  ;;  %746 = vmatprep.subr.mxu1 %v3052_v54  ;;  %4272 = vst [vmem:[#allocation32_spill] sm:$0xff] %v3150_v47  ;;  %4273 = vst [vmem:[#allocation33_spill] sm:$0xff] %v3152_v48 }
  0x4d   :  { %676 = vmatpush1.msra.mxu0 %v3056_v55  ;;  %747 = vmatpush1.msra.mxu1 %v3058_v56 }
  0x4e   :  { %677 = vmatprep.subr.mxu0 %v3062_v57  ;;  %748 = vmatprep.subr.mxu1 %v3064_v58 }
  0x4f   :  { %678 = vmatpush1.msra.mxu0 %v3068_v59  ;;  %749 = vmatpush1.msra.mxu1 %v3070_v60 }
  0x50   :  { %679 = vmatprep.subr.mxu0 %v3074_v61  ;;  %750 = vmatprep.subr.mxu1 %v3076_v62 }
  0x51   :  { %680 = vmatpush1.msra.mxu0 %v3080_v63  ;;  %751 = vmatpush1.msra.mxu1 %v3082_v1 }
  0x52   :  { %681 = vmatprep.subr.mxu0 %v3086_v2  ;;  %752 = vmatprep.subr.mxu1 %v3088_v3 }
  0x53   :  { %682 = vmatpush1.msra.mxu0 %v3092_v4  ;;  %753 = vmatpush1.msra.mxu1 %v3094_v5 }
  0x54   :  { %683 = vmatprep.subr.mxu0 %v3098_v6  ;;  %754 = vmatprep.subr.mxu1 %v3100_v7 }
  0x55   :  { %684 = vmatpush1.msra.mxu0 %v3104_v8  ;;  %755 = vmatpush1.msra.mxu1 %v3106_v9 }
  0x56   :  { %685 = vmatprep.subr.mxu0 %v3110_v10  ;;  %756 = vmatprep.subr.mxu1 %v3112_v11 }
  0x57   :  { %686 = vmatpush1.msra.mxu0 %v3116_v12  ;;  %757 = vmatpush1.msra.mxu1 %v3118_v17 }
  0x58   :  { %687 = vmatprep.subr.mxu0 %v3122_v18  ;;  %758 = vmatprep.subr.mxu1 %v3124_v23  ;;  %v3156_v23 = vld [vmem:[#allocation8 + $0x10] sm:$0xff] }
  0x59   :  { %688 = vmatpush1.msra.mxu0 %v3128_v24  ;;  %759 = vmatpush1.msra.mxu1 %v3130_v29  ;;  %4274 = vst [vmem:[#allocation34_spill] sm:$0xff] %v3156_v23 }
  0x5a   :  { %689 = vmatprep.subr.mxu0 %v3134_v30  ;;  %760 = vmatprep.subr.mxu1 %v3136_v35 }
  0x5b   :  { %690 = vmatpush1.msra.mxu0 %v3140_v36  ;;  %725 = vmatprep.mubr.f32.mxu0 %v4134_v0 }
  0x5c   :  { %691 = vmatprep.subr.mxu0 %v3144_v41  ;;  %761 = vmatpush1.msra.mxu1 %v3146_v42 }
  0x5d   :  { %692 = vmatpush1.msra.mxu0 %v3150_v47  ;;  %762 = vmatprep.subr.mxu1 %v3152_v48 }
  0x5e   :  { %726 = vmatmul.mubr.f32.vlgmr.msra.gmra.mxu0 %v4134_v0  ;;  %763 = vmatpush1.msra.mxu1 %v3156_v23 }
  0x5f   :  { %796 = vmatprep.mubr.f32.mxu1 %v4134_v0  ;;  %833 = vmatprep.subr.mxu0 %v2908_v13 }
  0x60   :  { %797 = vmatmul.mubr.f32.vlgmr.msra.gmra.mxu1 %v4134_v0  ;;  %904 = vmatprep.subr.mxu1 %v2914_v15  ;;  %v4275_v0 = vld [vmem:[#allocation24_spill] sm:$0xff] }
  0x61   :  { %834 = vmatpush1.msra.mxu0 %v2912_v14  ;;  %905 = vmatpush1.msra.mxu1 %v2916_v16 }
  0x62   :  { %835 = vmatprep.subr.mxu0 %v2929_v19  ;;  %906 = vmatprep.subr.mxu1 %v2932_v20 }
  0x63   :  { %836 = vmatpush1.msra.mxu0 %v2936_v21  ;;  %907 = vmatpush1.msra.mxu1 %v2938_v22 }
  0x64   :  { %837 = vmatprep.subr.mxu0 %v2951_v25  ;;  %908 = vmatprep.subr.mxu1 %v2954_v26 }
  0x65   :  { %838 = vmatpush1.msra.mxu0 %v2958_v27  ;;  %909 = vmatpush1.msra.mxu1 %v2960_v28 }
  0x66   :  { %839 = vmatprep.subr.mxu0 %v2973_v31  ;;  %910 = vmatprep.subr.mxu1 %v2976_v32 }
  0x67   :  { %840 = vmatpush1.msra.mxu0 %v2980_v33  ;;  %911 = vmatpush1.msra.mxu1 %v2982_v34 }
  0x68   :  { %841 = vmatprep.subr.mxu0 %v2995_v37  ;;  %912 = vmatprep.subr.mxu1 %v2998_v38 }
  0x69   :  { %842 = vmatpush1.msra.mxu0 %v3002_v39  ;;  %913 = vmatpush1.msra.mxu1 %v3004_v40 }
  0x6a   :  { %843 = vmatprep.subr.mxu0 %v3017_v43  ;;  %914 = vmatprep.subr.mxu1 %v3020_v44 }
  0x6b   :  { %844 = vmatpush1.msra.mxu0 %v3024_v45  ;;  %915 = vmatpush1.msra.mxu1 %v3026_v46 }
  0x6c   :  { %845 = vmatprep.subr.mxu0 %v3037_v49  ;;  %916 = vmatprep.subr.mxu1 %v3040_v50 }
  0x6d   :  { %846 = vmatpush1.msra.mxu0 %v3043_v51  ;;  %917 = vmatpush1.msra.mxu1 %v3046_v52 }
  0x6e   :  { %847 = vmatprep.subr.mxu0 %v3050_v53  ;;  %918 = vmatprep.subr.mxu1 %v3052_v54 }
  0x6f   :  { %848 = vmatpush1.msra.mxu0 %v3056_v55  ;;  %919 = vmatpush1.msra.mxu1 %v3058_v56 }
  0x70   :  { %849 = vmatprep.subr.mxu0 %v3062_v57  ;;  %920 = vmatprep.subr.mxu1 %v3064_v58 }
  0x71   :  { %850 = vmatpush1.msra.mxu0 %v3068_v59  ;;  %921 = vmatpush1.msra.mxu1 %v3070_v60 }
  0x72   :  { %851 = vmatprep.subr.mxu0 %v3074_v61  ;;  %922 = vmatprep.subr.mxu1 %v3076_v62 }
  0x73   :  { %852 = vmatpush1.msra.mxu0 %v3080_v63  ;;  %923 = vmatpush1.msra.mxu1 %v3082_v1 }
  0x74   :  { %853 = vmatprep.subr.mxu0 %v3086_v2  ;;  %924 = vmatprep.subr.mxu1 %v3088_v3 }
  0x75   :  { %854 = vmatpush1.msra.mxu0 %v3092_v4  ;;  %925 = vmatpush1.msra.mxu1 %v3094_v5 }
  0x76   :  { %855 = vmatprep.subr.mxu0 %v3098_v6  ;;  %926 = vmatprep.subr.mxu1 %v3100_v7 }
  0x77   :  { %856 = vmatpush1.msra.mxu0 %v3104_v8  ;;  %927 = vmatpush1.msra.mxu1 %v3106_v9 }
  0x78   :  { %857 = vmatprep.subr.mxu0 %v3110_v10  ;;  %928 = vmatprep.subr.mxu1 %v3112_v11 }
  0x79   :  { %858 = vmatpush1.msra.mxu0 %v3116_v12  ;;  %929 = vmatpush1.msra.mxu1 %v3118_v17 }
  0x7a   :  { %859 = vmatprep.subr.mxu0 %v3122_v18  ;;  %930 = vmatprep.subr.mxu1 %v4275_v0  ;;  %v4276_v18 = vmov 0.0  }
  0x7b   :  { %860 = vmatpush1.msra.mxu0 %v3128_v24  ;;  %931 = vmatpush1.msra.mxu1 %v3130_v29 }
  0x7c   :  { %861 = vmatprep.subr.mxu0 %v3134_v30  ;;  %932 = vmatprep.subr.mxu1 %v3136_v35  ;;  %v91_v35 = vlaneseq }
  0x7d   :  { %862 = vmatpush1.msra.mxu0 %v3140_v36  ;;  %933 = vmatpush1.msra.mxu1 %v3146_v42 }
  0x7e   :  { %863 = vmatprep.subr.mxu0 %v3144_v41  ;;  %934 = vmatprep.subr.mxu1 %v3152_v48  ;;  %v92_v36 = vshrl.u32 %v91_v35, 7  ;;  %v251_v41 = vld [vmem:[%s4126_s5] sm:$0x3]  ;;  %s2809_s5 = smov 64  }
  0x7f   :  { %864 = vmatpush1.msra.mxu0 %v3150_v47  ;;  %897 = vmatprep.mubr.f32.mxu0 %v4276_v18  ;;  %v89_v47 = vld [vmem:[%s4125_s4] sm:$0x3] }
  0x80   :  { %935 = vmatpush1.msra.mxu1 %v3156_v23  ;;  %968 = vmatprep.mubr.f32.mxu1 %v4276_v18  ;;  %v93_v30 = vsub.s32 0, %v92_v36  ;;  %v97_v48 = vsub.s32 1, %v92_v36 }
  0x81   :  { %1005 = vmatprep.subr.mxu0 %v2908_v13  ;;  %1076 = vmatprep.subr.mxu1 %v2914_v15 }
  0x82   :  { %v3240_v42 = vrot.slane %v251_v41, %v93_v30  ;;  %v3242_v23 = vrot.slane %v89_v47, %v93_v30  ;;  %v3244_v18 = vrot.slane %v251_v41, %v97_v48  ;;  %v3257_v30 = vrot.slane %v89_v47, %v97_v48 }
  0xef   :  { %v353_v13 = vpop.f32.mrf.mxu1  ;;  %v192_v15 = vpop.f32.mrf.mxu0 }
  0xf0   :  { %v3247_v35 = vadd.f32 %v353_v13, %v3240_v42  ;;  %v3250_v24 = vadd.f32 %v192_v15, %v3242_v23 }
  0xf1   :  { %v355_v29 = vpop.f32.mrf.mxu1  ;;  %v194_v41 = vpop.f32.mrf.mxu0 }
  0xf2   :  { %v3253_v36 = vadd.f32 %v355_v29, %v3244_v18  ;;  %408 = vrot.lane.b32.xlu0 %v3247_v35, %s2809_s5  ;;  %v3262_v17 = vadd.f32 %v194_v41, %v3257_v30 }
  0xf3   :  { %v359_v0 = vpop.f32.mrf.mxu1  ;;  %v198_v13 = vpop.f32.mrf.mxu0 }
  0xf4   :  { %472 = vrot.lane.b32.xlu1 %v3253_v36, %s2809_s5  ;;  %v3267_v15 = vadd.f32 %v359_v0, %v3240_v42  ;;  %v3272_v47 = vadd.f32 %v198_v13, %v3242_v23 }
  0xf5   :  { %v361_v29 = vpop.f32.mrf.mxu1  ;;  %v200_v48 = vpop.f32.mrf.mxu0 }
  0xf6   :  { %440 = vrot.lane.b32.xlu0 %v3250_v24, %s2809_s5  ;;  %4277 = vst [vmem:[#allocation35_spill] sm:$0xff] %v3267_v15  ;;  %4278 = vst [vmem:[#allocation36_spill] sm:$0xff] %v3272_v47  ;;  %v3277_v41 = vadd.f32 %v361_v29, %v3244_v18  ;;  %v3282_v0 = vadd.f32 %v200_v48, %v3257_v30 }
  0xf7   :  { %v365_v12 = vpop.f32.mrf.mxu1  ;;  %v204_v11 = vpop.f32.mrf.mxu0 }
  0xf8   :  { %504 = vrot.lane.b32.xlu1 %v3262_v17, %s2809_s5  ;;  %4279 = vst [vmem:[#allocation37_spill] sm:$0xff] %v3277_v41  ;;  %4280 = vst [vmem:[#allocation38_spill] sm:$0xff] %v3282_v0  ;;  %v3287_v13 = vadd.f32 %v365_v12, %v3240_v42  ;;  %v3292_v29 = vadd.f32 %v204_v11, %v3242_v23 }
  0xf9   :  { %v367_v10 = vpop.f32.mrf.mxu1 }
  0xfa   :  { %410 = vrot.lane.b32.xlu0 %v3267_v15, %s2809_s5  ;;  %4281 = vst [vmem:[#allocation39_spill] sm:$0xff] %v3287_v13  ;;  %4282 = vst [vmem:[#allocation40_spill] sm:$0xff] %v3292_v29  ;;  %v206_v15 = vpop.f32.mrf.mxu0  ;;  %v3297_v48 = vadd.f32 %v367_v10, %v3244_v18 }
  0xfb   :  { %v3302_v12 = vadd.f32 %v206_v15, %v3257_v30 }
  0xfc   :  { %442 = vrot.lane.b32.xlu1 %v3272_v47, %s2809_s5  ;;  %4283 = vst [vmem:[#allocation41_spill] sm:$0xff] %v3297_v48  ;;  %v371_v47 = vpop.f32.mrf.mxu1 }
  0xfd   :  { %4284 = vst [vmem:[#allocation42_spill] sm:$0xff] %v3302_v12  ;;  %v3307_v11 = vadd.f32 %v371_v47, %v3240_v42 }
  0xfe   :  { %474 = vrot.lane.b32.xlu0 %v3277_v41, %s2809_s5  ;;  %v210_v41 = vpop.f32.mrf.mxu0 }
  0xff   :  { %4285 = vst [vmem:[#allocation43_spill] sm:$0xff] %v3307_v11  ;;  %v3312_v10 = vadd.f32 %v210_v41, %v3242_v23 }
 0x100   :  { %506 = vrot.lane.b32.xlu1 %v3282_v0, %s2809_s5  ;;  %v373_v0 = vpop.f32.mrf.mxu1 }
 0x101   :  { %4286 = vst [vmem:[#allocation44_spill] sm:$0xff] %v3312_v10  ;;  %v3317_v15 = vadd.f32 %v373_v0, %v3244_v18 }
 0x102   :  { %412 = vrot.lane.b32.xlu0 %v3287_v13, %s2809_s5  ;;  %v212_v13 = vpop.f32.mrf.mxu0 }
 0x103   :  { %4287 = vst [vmem:[#allocation45_spill] sm:$0xff] %v3317_v15  ;;  %v3322_v47 = vadd.f32 %v212_v13, %v3257_v30 }
 0x104   :  { %444 = vrot.lane.b32.xlu1 %v3292_v29, %s2809_s5  ;;  %v377_v29 = vpop.f32.mrf.mxu1 }
 0x105   :  { %4288 = vst [vmem:[#allocation46_spill] sm:$0xff] %v3322_v47  ;;  %v3327_v41 = vadd.f32 %v377_v29, %v3240_v42 }
 0x106   :  { %476 = vrot.lane.b32.xlu0 %v3297_v48, %s2809_s5  ;;  %v216_v48 = vpop.f32.mrf.mxu0 }
 0x107   :  { %4289 = vst [vmem:[#allocation47_spill] sm:$0xff] %v3327_v41  ;;  %v3332_v0 = vadd.f32 %v216_v48, %v3242_v23 }
 0x108   :  { %508 = vrot.lane.b32.xlu1 %v3302_v12, %s2809_s5  ;;  %v379_v12 = vpop.f32.mrf.mxu1 }
 0x109   :  { %4290 = vst [vmem:[#allocation48_spill] sm:$0xff] %v3332_v0  ;;  %v3337_v13 = vadd.f32 %v379_v12, %v3244_v18 }
 0x10a   :  { %414 = vrot.lane.b32.xlu0 %v3307_v11, %s2809_s5  ;;  %v218_v11 = vpop.f32.mrf.mxu0 }
 0x10b   :  { %4291 = vst [vmem:[#allocation49_spill] sm:$0xff] %v3337_v13  ;;  %v3342_v29 = vadd.f32 %v218_v11, %v3257_v30 }
 0x10c   :  { %446 = vrot.lane.b32.xlu1 %v3312_v10, %s2809_s5  ;;  %v383_v10 = vpop.f32.mrf.mxu1 }
 0x10d   :  { %4292 = vst [vmem:[#allocation50_spill] sm:$0xff] %v3342_v29  ;;  %v3347_v48 = vadd.f32 %v383_v10, %v3240_v42 }
 0x10e   :  { %478 = vrot.lane.b32.xlu0 %v3317_v15, %s2809_s5  ;;  %v222_v15 = vpop.f32.mrf.mxu0 }
 0x10f   :  { %4293 = vst [vmem:[#allocation51_spill] sm:$0xff] %v3347_v48  ;;  %v3352_v12 = vadd.f32 %v222_v15, %v3242_v23 }
 0x110   :  { %510 = vrot.lane.b32.xlu1 %v3322_v47, %s2809_s5  ;;  %v385_v47 = vpop.f32.mrf.mxu1 }
 0x111   :  { %4294 = vst [vmem:[#allocation52_spill] sm:$0xff] %v3352_v12  ;;  %v3357_v11 = vadd.f32 %v385_v47, %v3244_v18 }
 0x112   :  { %416 = vrot.lane.b32.xlu0 %v3327_v41, %s2809_s5  ;;  %v224_v41 = vpop.f32.mrf.mxu0 }
 0x113   :  { %4295 = vst [vmem:[#allocation53_spill] sm:$0xff] %v3357_v11  ;;  %v3362_v10 = vadd.f32 %v224_v41, %v3257_v30 }
 0x114   :  { %448 = vrot.lane.b32.xlu1 %v3332_v0, %s2809_s5  ;;  %v389_v0 = vpop.f32.mrf.mxu1 }
 0x115   :  { %4296 = vst [vmem:[#allocation54_spill] sm:$0xff] %v3362_v10  ;;  %v3367_v15 = vadd.f32 %v389_v0, %v3240_v42 }
 0x116   :  { %480 = vrot.lane.b32.xlu0 %v3337_v13, %s2809_s5  ;;  %v228_v13 = vpop.f32.mrf.mxu0 }
 0x117   :  { %4297 = vst [vmem:[#allocation55_spill] sm:$0xff] %v3367_v15  ;;  %v3372_v47 = vadd.f32 %v228_v13, %v3242_v23 }
 0x118   :  { %512 = vrot.lane.b32.xlu1 %v3342_v29, %s2809_s5  ;;  %v391_v29 = vpop.f32.mrf.mxu1 }
 0x119   :  { %4298 = vst [vmem:[#allocation56_spill] sm:$0xff] %v3372_v47  ;;  %v3377_v41 = vadd.f32 %v391_v29, %v3244_v18 }
 0x11a   :  { %418 = vrot.lane.b32.xlu0 %v3347_v48, %s2809_s5  ;;  %v230_v48 = vpop.f32.mrf.mxu0 }
 0x11b   :  { %4299 = vst [vmem:[#allocation57_spill] sm:$0xff] %v3377_v41  ;;  %v3382_v0 = vadd.f32 %v230_v48, %v3257_v30 }
 0x11c   :  { %450 = vrot.lane.b32.xlu1 %v3352_v12, %s2809_s5  ;;  %v395_v12 = vpop.f32.mrf.mxu1 }
 0x11d   :  { %4300 = vst [vmem:[#allocation58_spill] sm:$0xff] %v3382_v0  ;;  %v3387_v13 = vadd.f32 %v395_v12, %v3240_v42 }
 0x11e   :  { %482 = vrot.lane.b32.xlu0 %v3357_v11, %s2809_s5  ;;  %v234_v11 = vpop.f32.mrf.mxu0 }
 0x11f   :  { %4301 = vst [vmem:[#allocation59_spill] sm:$0xff] %v3387_v13  ;;  %v3392_v29 = vadd.f32 %v234_v11, %v3242_v23 }
 0x120   :  { %514 = vrot.lane.b32.xlu1 %v3362_v10, %s2809_s5  ;;  %v397_v10 = vpop.f32.mrf.mxu1 }
 0x121   :  { %4302 = vst [vmem:[#allocation60_spill] sm:$0xff] %v3392_v29  ;;  %v3397_v48 = vadd.f32 %v397_v10, %v3244_v18 }
 0x122   :  { %420 = vrot.lane.b32.xlu0 %v3367_v15, %s2809_s5  ;;  %v236_v15 = vpop.f32.mrf.mxu0 }
 0x123   :  { %4303 = vst [vmem:[#allocation61_spill] sm:$0xff] %v3397_v48  ;;  %v3402_v42 = vadd.f32 %v236_v15, %v3257_v30 }
 0x124   :  { %452 = vrot.lane.b32.xlu1 %v3372_v47, %s2809_s5  ;;  %v727_v23 = vpop.f32.mrf.mxu0 }
 0x125   :  { %4304 = vst [vmem:[#allocation62_spill] sm:$0xff] %v3402_v42 }
 0x126   :  { %484 = vrot.lane.b32.xlu0 %v3377_v41, %s2809_s5  ;;  %v729_v41 = vpop.f32.mrf.mxu0 }
 0x128   :  { %516 = vrot.lane.b32.xlu1 %v3382_v0, %s2809_s5  ;;  %v798_v0 = vpop.f32.mrf.mxu1 }
 0x12a   :  { %422 = vrot.lane.b32.xlu0 %v3387_v13, %s2809_s5 }
 0x12c   :  { %454 = vrot.lane.b32.xlu1 %v3392_v29, %s2809_s5 }
 0x12e   :  { %486 = vrot.lane.b32.xlu0 %v3397_v48, %s2809_s5 }
 0x130   :  { %518 = vrot.lane.b32.xlu1 %v3402_v42, %s2809_s5 }
 0x164   :  { %v409_v12 = vpop.permute.xlu0 %408 }
 0x165   :  { %v529_v11 = vsel %vm528_vm1, %v3250_v24, %v409_v12 }
 0x166   :  { %v728_v18 = vadd.f32 %v727_v23, %v529_v11  ;;  %v473_v48 = vpop.permute.xlu1 %472  ;;  %v800_v23 = vpop.f32.mrf.mxu1 }
 0x167   :  { %v545_v42 = vsel %vm528_vm1, %v3262_v17, %v473_v48 }
 0x168   :  { %v2348_v10 = vmul.f32 -1.442695, %v728_v18  ;;  %v441_v13 = vpop.permute.xlu0 %440  ;;  %v799_v47 = vadd.f32 %v798_v0, %v545_v42 }
 0x169   :  { %v537_v30 = vsel %vm528_vm1, %v441_v13, %v3247_v35 }
 0x16a   :  { %2521 = vpow2.f32 %v2348_v10  ;;  %v730_v15 = vadd.f32 %v729_v41, %v537_v30  ;;  %v505_v9 = vpop.permute.xlu1 %504  ;;  %v2350_v11 = vmul.f32 -1.442695, %v799_v47 }
 0x16b   :  { %v553_v24 = vsel %vm528_vm1, %v505_v9, %v3253_v36 }
 0x16c   :  { %v2349_v29 = vmul.f32 -1.442695, %v730_v15  ;;  %v801_v8 = vadd.f32 %v800_v23, %v553_v24  ;;  %v4307_v15 = vld [vmem:[#allocation18_spill] sm:$0xff]  ;;  %v4308_v24 = vld [vmem:[#allocation19_spill] sm:$0xff]  ;;  %v4309_v23 = vld [vmem:[#allocation20_spill] sm:$0xff] }
 0x16e   :  { %2523 = vpow2.f32 %v2349_v29 }
 0x16f   :  { %2525 = vpow2.f32 %v2350_v11  ;;  %v4311_v11 = vld [vmem:[#allocation22_spill] sm:$0xff] }
 0x177   :  { %v2522_v12 = vpop.eup %2521 }
 0x178   :  { %v812_v18 = vadd.f32 1.0, %v2522_v12  ;;  %v4310_v12 = vld [vmem:[#allocation21_spill] sm:$0xff] }
 0x17a   :  { %2527 = vrcp.f32 %v812_v18  ;;  %v4312_v18 = vld [vmem:[#allocation23_spill] sm:$0xff] }
 0x17b   :  { %v2524_v35 = vpop.eup %2523  ;;  %2529 = vtanh.f32 %v801_v8  ;;  %v4306_v8 = vld [vmem:[#allocation17_spill] sm:$0xff] }
 0x17c   :  { %v813_v41 = vadd.f32 1.0, %v2524_v35  ;;  %v2526_v13 = vpop.eup %2525  ;;  %v4313_v35 = vld [vmem:[#allocation24_spill] sm:$0xff] }
 0x17d   :  { %v814_v0 = vadd.f32 1.0, %v2526_v13  ;;  %v4315_v13 = vld [vmem:[#allocation26_spill] sm:$0xff] }
 0x17e   :  { %2531 = vrcp.f32 %v813_v41  ;;  %v4314_v41 = vld [vmem:[#allocation25_spill] sm:$0xff] }
 0x17f   :  { %2533 = vrcp.f32 %v814_v0  ;;  %v4319_v0 = vld [vmem:[#allocation31_spill] sm:$0xff] }
 0x187   :  { %v2528_v29 = vpop.eup %2527 }
 0x188   :  { %v2530_v17 = vpop.eup %2529 }
 0x189   :  { %v823_v10 = vmul.f32 %v2530_v17, %v2528_v29  ;;  %v4316_v29 = vld [vmem:[#allocation27_spill] sm:$0xff]  ;;  %v4317_v17 = vld [vmem:[#allocation28_spill] sm:$0xff] }
 0x18b   :  { %v2532_v48 = vpop.eup %2531 }
 0x18c   :  { %v822_v42 = vmul.f32 0.0, %v2532_v48  ;;  %v2534_v9 = vpop.eup %2533  ;;  %v4318_v48 = vld [vmem:[#allocation29_spill] sm:$0xff] }
 0x18e   :  { %v3416_v30 = vadd.f32 %v823_v10, %v822_v42  ;;  %v4320_v42 = vld [vmem:[#allocation30_spill] sm:$0xff]  ;;  %v4321_v10 = vld [vmem:[#allocation33_spill] sm:$0xff] }
 0x190   :  { %2535 = vtanh.f32 %v3416_v30 }
 0x19d   :  { %v2536_v36 = vpop.eup %2535 }
 0x19e   :  { %v3419_v47 = vmul.f32 %v2536_v36, %v2534_v9  ;;  %v4322_v9 = vld [vmem:[#allocation32_spill] sm:$0xff]  ;;  %v4323_v36 = vmov 0.0  }
 0x1a0   :  { %4305 = vst [vmem:[#allocation63_spill] sm:$0xff] %v3419_v47  ;;  %898 = vmatmul.mubr.f32.vlgmr.msra.gmra.mxu0 %v3419_v47  ;;  %969 = vmatmul.mubr.f32.vlgmr.msra.gmra.mxu1 %v3419_v47  ;;  %v4324_v47 = vld [vmem:[#allocation34_spill] sm:$0xff] }
 0x1a1   :  { %1006 = vmatpush1.msra.mxu0 %v2912_v14  ;;  %1077 = vmatpush1.msra.mxu1 %v2916_v16 }
 0x1a2   :  { %1007 = vmatprep.subr.mxu0 %v2929_v19  ;;  %1078 = vmatprep.subr.mxu1 %v2932_v20 }
 0x1a3   :  { %1008 = vmatpush1.msra.mxu0 %v2936_v21  ;;  %1079 = vmatpush1.msra.mxu1 %v2938_v22 }
 0x1a4   :  { %1009 = vmatprep.subr.mxu0 %v2951_v25  ;;  %1080 = vmatprep.subr.mxu1 %v2954_v26 }
 0x1a5   :  { %1010 = vmatpush1.msra.mxu0 %v2958_v27  ;;  %1081 = vmatpush1.msra.mxu1 %v2960_v28 }
 0x1a6   :  { %1011 = vmatprep.subr.mxu0 %v2973_v31  ;;  %1082 = vmatprep.subr.mxu1 %v2976_v32 }
 0x1a7   :  { %1012 = vmatpush1.msra.mxu0 %v2980_v33  ;;  %1083 = vmatpush1.msra.mxu1 %v2982_v34 }
 0x1a8   :  { %1013 = vmatprep.subr.mxu0 %v2995_v37  ;;  %1084 = vmatprep.subr.mxu1 %v2998_v38 }
 0x1a9   :  { %1014 = vmatpush1.msra.mxu0 %v3002_v39  ;;  %1085 = vmatpush1.msra.mxu1 %v3004_v40 }
 0x1aa   :  { %1015 = vmatprep.subr.mxu0 %v3017_v43  ;;  %1086 = vmatprep.subr.mxu1 %v3020_v44 }
 0x1ab   :  { %1016 = vmatpush1.msra.mxu0 %v3024_v45  ;;  %1087 = vmatpush1.msra.mxu1 %v3026_v46 }
 0x1ac   :  { %1017 = vmatprep.subr.mxu0 %v3037_v49  ;;  %1088 = vmatprep.subr.mxu1 %v3040_v50 }
 0x1ad   :  { %1018 = vmatpush1.msra.mxu0 %v3043_v51  ;;  %1089 = vmatpush1.msra.mxu1 %v3046_v52 }
 0x1ae   :  { %1019 = vmatprep.subr.mxu0 %v3050_v53  ;;  %1090 = vmatprep.subr.mxu1 %v3052_v54 }
 0x1af   :  { %1020 = vmatpush1.msra.mxu0 %v3056_v55  ;;  %1091 = vmatpush1.msra.mxu1 %v3058_v56 }
 0x1b0   :  { %1021 = vmatprep.subr.mxu0 %v3062_v57  ;;  %1092 = vmatprep.subr.mxu1 %v3064_v58 }
 0x1b1   :  { %1022 = vmatpush1.msra.mxu0 %v3068_v59  ;;  %1093 = vmatpush1.msra.mxu1 %v3070_v60 }
 0x1b2   :  { %1023 = vmatprep.subr.mxu0 %v3074_v61  ;;  %1094 = vmatprep.subr.mxu1 %v3076_v62 }
 0x1b3   :  { %1024 = vmatpush1.msra.mxu0 %v3080_v63  ;;  %1095 = vmatpush1.msra.mxu1 %v3082_v1 }
 0x1b4   :  { %1025 = vmatprep.subr.mxu0 %v3086_v2  ;;  %1096 = vmatprep.subr.mxu1 %v3088_v3 }
 0x1b5   :  { %1026 = vmatpush1.msra.mxu0 %v3092_v4  ;;  %1097 = vmatpush1.msra.mxu1 %v3094_v5 }
 0x1b6   :  { %1027 = vmatprep.subr.mxu0 %v3098_v6  ;;  %1098 = vmatprep.subr.mxu1 %v3100_v7 }
 0x1b7   :  { %1028 = vmatpush1.msra.mxu0 %v4306_v8  ;;  %1099 = vmatpush1.msra.mxu1 %v4307_v15 }
 0x1b8   :  { %1029 = vmatprep.subr.mxu0 %v4308_v24  ;;  %1100 = vmatprep.subr.mxu1 %v4309_v23  ;;  %v4329_v23 = vld [vmem:[#allocation38_spill] sm:$0xff] }
 0x1b9   :  { %1030 = vmatpush1.msra.mxu0 %v4310_v12  ;;  %1101 = vmatpush1.msra.mxu1 %v4311_v11 }
 0x1ba   :  { %1031 = vmatprep.subr.mxu0 %v4312_v18  ;;  %1102 = vmatprep.subr.mxu1 %v4313_v35 }
 0x1bb   :  { %1032 = vmatpush1.msra.mxu0 %v4314_v41  ;;  %1103 = vmatpush1.msra.mxu1 %v4315_v13  ;;  %v4325_v13 = vld [vmem:[#allocation15_spill] sm:$0xff]  ;;  %v4327_v41 = vld [vmem:[#allocation36_spill] sm:$0xff] }
 0x1bc   :  { %1033 = vmatprep.subr.mxu0 %v4316_v29  ;;  %1104 = vmatprep.subr.mxu1 %v4317_v17  ;;  %v4326_v29 = vld [vmem:[#allocation16_spill] sm:$0xff]  ;;  %v411_v17 = vpop.permute.xlu0 %410 }
 0x1bd   :  { %1034 = vmatpush1.msra.mxu0 %v4318_v48  ;;  %1105 = vmatpush1.msra.mxu1 %v4319_v0  ;;  %v443_v48 = vpop.permute.xlu1 %442  ;;  %v530_v0 = vsel %vm528_vm1, %v4327_v41, %v411_v17  ;;  %v4330_v17 = vld [vmem:[#allocation37_spill] sm:$0xff] }
 0x1be   :  { %1035 = vmatprep.subr.mxu0 %v4320_v42  ;;  %1106 = vmatprep.subr.mxu1 %v4321_v10  ;;  %v4328_v10 = vld [vmem:[#allocation35_spill] sm:$0xff] }
 0x1bf   :  { %1036 = vmatpush1.msra.mxu0 %v4322_v9  ;;  %1069 = vmatprep.mubr.f32.mxu0 %v4323_v36  ;;  %v538_v9 = vsel %vm528_vm1, %v443_v48, %v4328_v10 }
 0x1c0   :  { %1107 = vmatpush1.msra.mxu1 %v4324_v47  ;;  %1140 = vmatprep.mubr.f32.mxu1 %v4323_v36  ;;  %v475_v36 = vpop.permute.xlu0 %474 }
 0x1c1   :  { %1177 = vmatprep.subr.mxu0 %v4325_v13  ;;  %1248 = vmatprep.subr.mxu1 %v4326_v29  ;;  %v546_v29 = vsel %vm528_vm1, %v4329_v23, %v475_v36  ;;  %v507_v15 = vpop.permute.xlu1 %506 }
 0x260   :  { %v899_v42 = vpop.f32.mrf.mxu0  ;;  %v970_v13 = vpop.f32.mrf.mxu1 }
 0x261   :  { %v900_v35 = vadd.f32 %v899_v42, %v530_v0  ;;  %v971_v24 = vadd.f32 %v970_v13, %v546_v29  ;;  %v554_v0 = vsel %vm528_vm1, %v507_v15, %v4330_v17 }
 0x262   :  { %v901_v18 = vpop.f32.mrf.mxu0  ;;  %v972_v8 = vpop.f32.mrf.mxu1 }
 0x263   :  { %v2351_v11 = vmul.f32 -1.442695, %v900_v35  ;;  %v902_v12 = vadd.f32 %v901_v18, %v538_v9  ;;  %v2353_v41 = vmul.f32 -1.442695, %v971_v24  ;;  %v973_v48 = vadd.f32 %v972_v8, %v554_v0 }
 0x265   :  { %2537 = vpow2.f32 %v2351_v11  ;;  %v2352_v47 = vmul.f32 -1.442695, %v902_v12 }
 0x267   :  { %2539 = vpow2.f32 %v2352_v47 }
 0x268   :  { %2541 = vpow2.f32 %v2353_v41 }
 0x272   :  { %v2538_v42 = vpop.eup %2537 }
 0x273   :  { %v984_v10 = vadd.f32 1.0, %v2538_v42 }
 0x274   :  { %v2540_v35 = vpop.eup %2539 }
 0x275   :  { %2543 = vrcp.f32 %v984_v10  ;;  %v985_v12 = vadd.f32 1.0, %v2540_v35  ;;  %v2542_v47 = vpop.eup %2541 }
 0x276   :  { %2545 = vtanh.f32 %v973_v48  ;;  %v986_v9 = vadd.f32 1.0, %v2542_v47 }
 0x277   :  { %2547 = vrcp.f32 %v985_v12 }
 0x278   :  { %2549 = vrcp.f32 %v986_v9 }
 0x282   :  { %v2544_v11 = vpop.eup %2543 }
 0x283   :  { %v2546_v18 = vpop.eup %2545 }
 0x284   :  { %v2548_v23 = vpop.eup %2547  ;;  %v995_v24 = vmul.f32 %v2546_v18, %v2544_v11 }
 0x285   :  { %v994_v36 = vmul.f32 %v2548_v23, %v3416_v30  ;;  %v2550_v8 = vpop.eup %2549 }
 0x287   :  { %v3498_v13 = vadd.f32 %v995_v24, %v994_v36  ;;  %v3591_v24 = vld [vmem:[#allocation8 + $0x1e0] sm:$0xff] }
 0x289   :  { %2551 = vtanh.f32 %v3498_v13 }
 0x296   :  { %v2552_v15 = vpop.eup %2551 }
 0x297   :  { %v3501_v29 = vmul.f32 %v2552_v15, %v2550_v8  ;;  %v3594_v8 = vld [vmem:[#allocation8 + $0x1f0] sm:$0xff]  ;;  %v3600_v15 = vld [vmem:[#allocation8 + $0x1d8] sm:$0xff] }
 0x299   :  { %4331 = vst [vmem:[#allocation15_spill] sm:$0xff] %v3501_v29  ;;  %1070 = vmatmul.mubr.f32.vlgmr.msra.gmra.mxu0 %v3501_v29  ;;  %1141 = vmatmul.mubr.f32.vlgmr.msra.gmra.mxu1 %v3501_v29  ;;  %v3762_v29 = vld [vmem:[#allocation8 + $0x30] sm:$0xff] }
 0x29a   :  { %1178 = vmatpush1.msra.mxu0 %v2912_v14  ;;  %1249 = vmatpush1.msra.mxu1 %v2916_v16  ;;  %v4332_v14 = vld [vmem:[#allocation17_spill] sm:$0xff]  ;;  %v4333_v16 = vld [vmem:[#allocation18_spill] sm:$0xff] }
 0x29b   :  { %1179 = vmatprep.subr.mxu0 %v2929_v19  ;;  %1250 = vmatprep.subr.mxu1 %v2932_v20  ;;  %v4334_v19 = vld [vmem:[#allocation19_spill] sm:$0xff]  ;;  %v4335_v20 = vld [vmem:[#allocation20_spill] sm:$0xff] }
 0x29c   :  { %1180 = vmatpush1.msra.mxu0 %v2936_v21  ;;  %1251 = vmatpush1.msra.mxu1 %v2938_v22  ;;  %v4336_v21 = vld [vmem:[#allocation21_spill] sm:$0xff]  ;;  %v4337_v22 = vld [vmem:[#allocation22_spill] sm:$0xff] }
 0x29d   :  { %1181 = vmatprep.subr.mxu0 %v2951_v25  ;;  %1252 = vmatprep.subr.mxu1 %v2954_v26  ;;  %v4338_v25 = vld [vmem:[#allocation23_spill] sm:$0xff]  ;;  %v4339_v26 = vld [vmem:[#allocation24_spill] sm:$0xff] }
 0x29e   :  { %1182 = vmatpush1.msra.mxu0 %v2958_v27  ;;  %1253 = vmatpush1.msra.mxu1 %v2960_v28  ;;  %v4340_v27 = vld [vmem:[#allocation25_spill] sm:$0xff]  ;;  %v4341_v28 = vld [vmem:[#allocation26_spill] sm:$0xff] }
 0x29f   :  { %1183 = vmatprep.subr.mxu0 %v2973_v31  ;;  %1254 = vmatprep.subr.mxu1 %v2976_v32  ;;  %v4342_v31 = vld [vmem:[#allocation27_spill] sm:$0xff]  ;;  %v4343_v32 = vld [vmem:[#allocation28_spill] sm:$0xff] }
 0x2a0   :  { %1184 = vmatpush1.msra.mxu0 %v2980_v33  ;;  %1255 = vmatpush1.msra.mxu1 %v2982_v34  ;;  %v4344_v33 = vld [vmem:[#allocation29_spill] sm:$0xff]  ;;  %v4345_v34 = vld [vmem:[#allocation31_spill] sm:$0xff]  ;;  %4371 = vst [vmem:[#allocation28_spill] sm:$0xff] %v3762_v29 }
 0x2a1   :  { %1185 = vmatprep.subr.mxu0 %v2995_v37  ;;  %1256 = vmatprep.subr.mxu1 %v2998_v38  ;;  %v4346_v37 = vld [vmem:[#allocation30_spill] sm:$0xff]  ;;  %v4347_v38 = vld [vmem:[#allocation33_spill] sm:$0xff] }
 0x2a2   :  { %1186 = vmatpush1.msra.mxu0 %v3002_v39  ;;  %1257 = vmatpush1.msra.mxu1 %v3004_v40  ;;  %v4348_v39 = vld [vmem:[#allocation32_spill] sm:$0xff]  ;;  %v4349_v40 = vmov 0.0  }
 0x2a3   :  { %1187 = vmatprep.subr.mxu0 %v3017_v43  ;;  %1258 = vmatprep.subr.mxu1 %v3020_v44  ;;  %v4350_v43 = vld [vmem:[#allocation34_spill] sm:$0xff]  ;;  %v3569_v44 = vld [vmem:[#allocation8 + $0x1e8] sm:$0xff] }
 0x2a4   :  { %1188 = vmatpush1.msra.mxu0 %v3024_v45  ;;  %1259 = vmatpush1.msra.mxu1 %v3026_v46  ;;  %4351 = vst [vmem:[#allocation16_spill] sm:$0xff] %v3569_v44  ;;  %v3572_v45 = vld [vmem:[#allocation8 + $0x1f8] sm:$0xff]  ;;  %v413_v46 = vpop.permute.xlu0 %412 }
 0x2a5   :  { %1189 = vmatprep.subr.mxu0 %v3037_v49  ;;  %1260 = vmatprep.subr.mxu1 %v3040_v50  ;;  %4352 = vst [vmem:[#allocation36_spill] sm:$0xff] %v3572_v45  ;;  %v445_v49 = vpop.permute.xlu1 %444  ;;  %v4353_v50 = vld [vmem:[#allocation40_spill] sm:$0xff] }
 0x2a6   :  { %1190 = vmatpush1.msra.mxu0 %v3043_v51  ;;  %1261 = vmatpush1.msra.mxu1 %v3046_v52  ;;  %v531_v51 = vsel %vm528_vm1, %v4353_v50, %v413_v46  ;;  %v3651_v46 = vld [vmem:[#allocation8 + $0x140] sm:$0xff]  ;;  %v3657_v50 = vld [vmem:[#allocation8 + $0x128] sm:$0xff] }
 0x2a7   :  { %1191 = vmatprep.subr.mxu0 %v3050_v53  ;;  %1262 = vmatprep.subr.mxu1 %v3052_v54  ;;  %v4354_v54 = vld [vmem:[#allocation39_spill] sm:$0xff] }
 0x2a8   :  { %1192 = vmatpush1.msra.mxu0 %v3056_v55  ;;  %1263 = vmatpush1.msra.mxu1 %v3058_v56  ;;  %v539_v55 = vsel %vm528_vm1, %v445_v49, %v4354_v54  ;;  %v3654_v49 = vld [vmem:[#allocation8 + $0x150] sm:$0xff]  ;;  %v3669_v54 = vld [vmem:[#allocation8 + $0x108] sm:$0xff] }
 0x2a9   :  { %1193 = vmatprep.subr.mxu0 %v3062_v57  ;;  %1264 = vmatprep.subr.mxu1 %v3064_v58 }
 0x2aa   :  { %1194 = vmatpush1.msra.mxu0 %v3068_v59  ;;  %1265 = vmatpush1.msra.mxu1 %v3070_v60  ;;  %v477_v60 = vpop.permute.xlu0 %476 }
 0x2ab   :  { %1195 = vmatprep.subr.mxu0 %v3074_v61  ;;  %1266 = vmatprep.subr.mxu1 %v3076_v62  ;;  %v4355_v62 = vld [vmem:[#allocation42_spill] sm:$0xff] }
 0x2ac   :  { %1196 = vmatpush1.msra.mxu0 %v3080_v63  ;;  %1267 = vmatpush1.msra.mxu1 %v3082_v1  ;;  %v547_v63 = vsel %vm528_vm1, %v4355_v62, %v477_v60  ;;  %v3687_v60 = vld [vmem:[#allocation8 + $0xe0] sm:$0xff]  ;;  %v3693_v62 = vld [vmem:[#allocation8 + $0xc8] sm:$0xff] }
 0x2ad   :  { %1197 = vmatprep.subr.mxu0 %v3086_v2  ;;  %1268 = vmatprep.subr.mxu1 %v3088_v3  ;;  %v509_v2 = vpop.permute.xlu1 %508 }
 0x2ae   :  { %1198 = vmatpush1.msra.mxu0 %v3092_v4  ;;  %1269 = vmatpush1.msra.mxu1 %v3094_v5  ;;  %v4356_v5 = vld [vmem:[#allocation41_spill] sm:$0xff] }
 0x2af   :  { %1199 = vmatprep.subr.mxu0 %v3098_v6  ;;  %1270 = vmatprep.subr.mxu1 %v3100_v7  ;;  %v555_v6 = vsel %vm528_vm1, %v509_v2, %v4356_v5  ;;  %v3702_v2 = vld [vmem:[#allocation8 + $0xd0] sm:$0xff]  ;;  %v3711_v5 = vld [vmem:[#allocation8 + $0xa0] sm:$0xff] }
 0x2b0   :  { %1200 = vmatpush1.msra.mxu0 %v4332_v14  ;;  %1271 = vmatpush1.msra.mxu1 %v4333_v16  ;;  %v3603_v14 = vld [vmem:[#allocation8 + $0x1c0] sm:$0xff]  ;;  %v3606_v16 = vld [vmem:[#allocation8 + $0x1d0] sm:$0xff] }
 0x2b1   :  { %1201 = vmatprep.subr.mxu0 %v4334_v19  ;;  %1272 = vmatprep.subr.mxu1 %v4335_v20  ;;  %v3609_v19 = vld [vmem:[#allocation8 + $0x1a8] sm:$0xff]  ;;  %v3612_v20 = vld [vmem:[#allocation8 + $0x1b8] sm:$0xff] }
 0x2b2   :  { %1202 = vmatpush1.msra.mxu0 %v4336_v21  ;;  %1273 = vmatpush1.msra.mxu1 %v4337_v22  ;;  %v3615_v21 = vld [vmem:[#allocation8 + $0x1a0] sm:$0xff]  ;;  %v3618_v22 = vld [vmem:[#allocation8 + $0x1b0] sm:$0xff] }
 0x2b3   :  { %1203 = vmatprep.subr.mxu0 %v4338_v25  ;;  %1274 = vmatprep.subr.mxu1 %v4339_v26  ;;  %v3621_v25 = vld [vmem:[#allocation8 + $0x188] sm:$0xff]  ;;  %v3624_v26 = vld [vmem:[#allocation8 + $0x198] sm:$0xff] }
 0x2b4   :  { %1204 = vmatpush1.msra.mxu0 %v4340_v27  ;;  %1275 = vmatpush1.msra.mxu1 %v4341_v28  ;;  %v3627_v27 = vld [vmem:[#allocation8 + $0x180] sm:$0xff]  ;;  %v3630_v28 = vld [vmem:[#allocation8 + $0x190] sm:$0xff] }
 0x2b5   :  { %1205 = vmatprep.subr.mxu0 %v4342_v31  ;;  %1276 = vmatprep.subr.mxu1 %v4343_v32  ;;  %v3633_v31 = vld [vmem:[#allocation8 + $0x168] sm:$0xff]  ;;  %v3636_v32 = vld [vmem:[#allocation8 + $0x178] sm:$0xff] }
 0x2b6   :  { %1206 = vmatpush1.msra.mxu0 %v4344_v33  ;;  %1277 = vmatpush1.msra.mxu1 %v4345_v34  ;;  %v3639_v33 = vld [vmem:[#allocation8 + $0x160] sm:$0xff]  ;;  %v3642_v34 = vld [vmem:[#allocation8 + $0x170] sm:$0xff] }
 0x2b7   :  { %1207 = vmatprep.subr.mxu0 %v4346_v37  ;;  %1278 = vmatprep.subr.mxu1 %v4347_v38  ;;  %v3645_v37 = vld [vmem:[#allocation8 + $0x148] sm:$0xff] }
 0x2b8   :  { %1208 = vmatpush1.msra.mxu0 %v4348_v39  ;;  %1241 = vmatprep.mubr.f32.mxu0 %v4349_v40  ;;  %v3648_v39 = vld [vmem:[#allocation8 + $0x158] sm:$0xff] }
 0x2b9   :  { %1279 = vmatpush1.msra.mxu1 %v4350_v43  ;;  %1312 = vmatprep.mubr.f32.mxu1 %v4349_v40 }
 0x2ba   :  { %1349 = vmatprep.subr.mxu0 %v3569_v44  ;;  %1420 = vmatprep.subr.mxu1 %v3572_v45 }
 0x359   :  { %v1071_v52 = vpop.f32.mrf.mxu0  ;;  %v1142_v61 = vpop.f32.mrf.mxu1 }
 0x35a   :  { %v1072_v53 = vadd.f32 %v1071_v52, %v531_v51  ;;  %v1143_v1 = vadd.f32 %v1142_v61, %v547_v63  ;;  %v3660_v51 = vld [vmem:[#allocation8 + $0x138] sm:$0xff]  ;;  %v3663_v52 = vld [vmem:[#allocation8 + $0x120] sm:$0xff]  ;;  %v3690_v61 = vld [vmem:[#allocation8 + $0xf0] sm:$0xff] }
 0x35b   :  { %v1073_v56 = vpop.f32.mrf.mxu0  ;;  %v1144_v3 = vpop.f32.mrf.mxu1  ;;  %v3696_v63 = vld [vmem:[#allocation8 + $0xd8] sm:$0xff] }
 0x35c   :  { %v2354_v57 = vmul.f32 -1.442695, %v1072_v53  ;;  %v1074_v58 = vadd.f32 %v1073_v56, %v539_v55  ;;  %v2356_v4 = vmul.f32 -1.442695, %v1143_v1  ;;  %v1145_v30 = vadd.f32 %v1144_v3, %v555_v6  ;;  %v3666_v53 = vld [vmem:[#allocation8 + $0x130] sm:$0xff]  ;;  %v3672_v55 = vld [vmem:[#allocation8 + $0x118] sm:$0xff] }
 0x35d   :  { %v3675_v56 = vld [vmem:[#allocation8 + $0x100] sm:$0xff]  ;;  %v3705_v3 = vld [vmem:[#allocation8 + $0xa8] sm:$0xff]  ;;  %v3714_v6 = vld [vmem:[#allocation8 + $0xb0] sm:$0xff] }
 0x35e   :  { %2553 = vpow2.f32 %v2354_v57  ;;  %v2355_v59 = vmul.f32 -1.442695, %v1074_v58  ;;  %v3678_v57 = vld [vmem:[#allocation8 + $0x110] sm:$0xff]  ;;  %v3681_v58 = vld [vmem:[#allocation8 + $0xe8] sm:$0xff]  ;;  %v3699_v1 = vld [vmem:[#allocation8 + $0xc0] sm:$0xff] }
 0x360   :  { %2555 = vpow2.f32 %v2355_v59  ;;  %v3684_v59 = vld [vmem:[#allocation8 + $0xf8] sm:$0xff] }
 0x361   :  { %2557 = vpow2.f32 %v2356_v4  ;;  %v3708_v4 = vld [vmem:[#allocation8 + $0xb8] sm:$0xff] }
 0x36b   :  { %v2554_v7 = vpop.eup %2553 }
 0x36c   :  { %v1156_v41 = vadd.f32 1.0, %v2554_v7  ;;  %v3717_v7 = vld [vmem:[#allocation8 + $0x88] sm:$0xff] }
 0x36d   :  { %v2556_v17 = vpop.eup %2555 }
 0x36e   :  { %2559 = vrcp.f32 %v1156_v41  ;;  %v1157_v0 = vadd.f32 1.0, %v2556_v17  ;;  %v2558_v42 = vpop.eup %2557  ;;  %v3723_v41 = vld [vmem:[#allocation8 + $0x80] sm:$0xff]  ;;  %v3726_v17 = vld [vmem:[#allocation8 + $0x90] sm:$0xff] }
 0x36f   :  { %2561 = vtanh.f32 %v1145_v30  ;;  %v1158_v12 = vadd.f32 1.0, %v2558_v42  ;;  %v3720_v30 = vld [vmem:[#allocation8 + $0x98] sm:$0xff]  ;;  %4358 = vst [vmem:[#allocation38_spill] sm:$0xff] %v3723_v41  ;;  %4359 = vst [vmem:[#allocation37_spill] sm:$0xff] %v3726_v17 }
 0x370   :  { %2563 = vrcp.f32 %v1157_v0  ;;  %v3729_v0 = vld [vmem:[#allocation8 + $0x68] sm:$0xff]  ;;  %v3732_v42 = vld [vmem:[#allocation8 + $0x78] sm:$0xff] }
 0x371   :  { %2565 = vrcp.f32 %v1158_v12  ;;  %4360 = vst [vmem:[#allocation17_spill] sm:$0xff] %v3729_v0  ;;  %4361 = vst [vmem:[#allocation18_spill] sm:$0xff] %v3732_v42  ;;  %v3744_v12 = vld [vmem:[#allocation8 + $0x58] sm:$0xff] }
 0x372   :  { %4365 = vst [vmem:[#allocation22_spill] sm:$0xff] %v3744_v12 }
 0x37b   :  { %v2560_v48 = vpop.eup %2559 }
 0x37c   :  { %v2562_v10 = vpop.eup %2561 }
 0x37d   :  { %v2564_v35 = vpop.eup %2563  ;;  %v1167_v11 = vmul.f32 %v2562_v10, %v2560_v48  ;;  %v3735_v48 = vld [vmem:[#allocation8 + $0x60] sm:$0xff]  ;;  %v3738_v10 = vld [vmem:[#allocation8 + $0x70] sm:$0xff] }
 0x37e   :  { %v1166_v47 = vmul.f32 %v2564_v35, %v3498_v13  ;;  %v2566_v23 = vpop.eup %2565  ;;  %v3597_v13 = vld [vmem:[#allocation8 + $0x1c8] sm:$0xff]  ;;  %4362 = vst [vmem:[#allocation19_spill] sm:$0xff] %v3735_v48  ;;  %4363 = vst [vmem:[#allocation20_spill] sm:$0xff] %v3738_v10 }
 0x37f   :  { %v3741_v35 = vld [vmem:[#allocation8 + $0x48] sm:$0xff] }
 0x380   :  { %v3584_v18 = vadd.f32 %v1167_v11, %v1166_v47  ;;  %4364 = vst [vmem:[#allocation21_spill] sm:$0xff] %v3741_v35  ;;  %v3747_v47 = vld [vmem:[#allocation8 + $0x40] sm:$0xff]  ;;  %v3750_v11 = vld [vmem:[#allocation8 + $0x50] sm:$0xff] }
 0x381   :  { %4366 = vst [vmem:[#allocation23_spill] sm:$0xff] %v3747_v47  ;;  %4367 = vst [vmem:[#allocation24_spill] sm:$0xff] %v3750_v11 }
 0x382   :  { %2567 = vtanh.f32 %v3584_v18 }
 0x38f   :  { %v2568_v9 = vpop.eup %2567 }
 0x390   :  { %v3587_v36 = vmul.f32 %v2568_v9, %v2566_v23  ;;  %v3753_v23 = vld [vmem:[#allocation8 + $0x28] sm:$0xff]  ;;  %v3756_v9 = vld [vmem:[#allocation8 + $0x38] sm:$0xff] }
 0x391   :  { %4368 = vst [vmem:[#allocation25_spill] sm:$0xff] %v3753_v23  ;;  %4369 = vst [vmem:[#allocation26_spill] sm:$0xff] %v3756_v9 }
 0x392   :  { %4357 = vst [vmem:[#allocation35_spill] sm:$0xff] %v3587_v36  ;;  %1242 = vmatmul.mubr.f32.vlgmr.msra.gmra.mxu0 %v3587_v36  ;;  %1313 = vmatmul.mubr.f32.vlgmr.msra.gmra.mxu1 %v3587_v36  ;;  %v3759_v36 = vld [vmem:[#allocation8 + $0x20] sm:$0xff] }
 0x393   :  { %1350 = vmatpush1.msra.mxu0 %v3591_v24  ;;  %1421 = vmatpush1.msra.mxu1 %v3594_v8  ;;  %4370 = vst [vmem:[#allocation27_spill] sm:$0xff] %v3759_v36 }
 0x394   :  { %1351 = vmatprep.subr.mxu0 %v3597_v13  ;;  %1422 = vmatprep.subr.mxu1 %v3600_v15 }
 0x395   :  { %1352 = vmatpush1.msra.mxu0 %v3603_v14  ;;  %1423 = vmatpush1.msra.mxu1 %v3606_v16 }
 0x396   :  { %1353 = vmatprep.subr.mxu0 %v3609_v19  ;;  %1424 = vmatprep.subr.mxu1 %v3612_v20 }
 0x397   :  { %1354 = vmatpush1.msra.mxu0 %v3615_v21  ;;  %1425 = vmatpush1.msra.mxu1 %v3618_v22 }
 0x398   :  { %1355 = vmatprep.subr.mxu0 %v3621_v25  ;;  %1426 = vmatprep.subr.mxu1 %v3624_v26 }
 0x399   :  { %1356 = vmatpush1.msra.mxu0 %v3627_v27  ;;  %1427 = vmatpush1.msra.mxu1 %v3630_v28 }
 0x39a   :  { %1357 = vmatprep.subr.mxu0 %v3633_v31  ;;  %1428 = vmatprep.subr.mxu1 %v3636_v32 }
 0x39b   :  { %1358 = vmatpush1.msra.mxu0 %v3639_v33  ;;  %1429 = vmatpush1.msra.mxu1 %v3642_v34 }
 0x39c   :  { %1359 = vmatprep.subr.mxu0 %v3645_v37  ;;  %1430 = vmatprep.subr.mxu1 %v3648_v39 }
 0x39d   :  { %1360 = vmatpush1.msra.mxu0 %v3651_v46  ;;  %1431 = vmatpush1.msra.mxu1 %v3654_v49 }
 0x39e   :  { %1361 = vmatprep.subr.mxu0 %v3657_v50  ;;  %1432 = vmatprep.subr.mxu1 %v3660_v51 }
 0x39f   :  { %1362 = vmatpush1.msra.mxu0 %v3663_v52  ;;  %1433 = vmatpush1.msra.mxu1 %v3666_v53 }
 0x3a0   :  { %1363 = vmatprep.subr.mxu0 %v3669_v54  ;;  %1434 = vmatprep.subr.mxu1 %v3672_v55 }
 0x3a1   :  { %1364 = vmatpush1.msra.mxu0 %v3675_v56  ;;  %1435 = vmatpush1.msra.mxu1 %v3678_v57 }
 0x3a2   :  { %1365 = vmatprep.subr.mxu0 %v3681_v58  ;;  %1436 = vmatprep.subr.mxu1 %v3684_v59 }
 0x3a3   :  { %1366 = vmatpush1.msra.mxu0 %v3687_v60  ;;  %1437 = vmatpush1.msra.mxu1 %v3690_v61 }
 0x3a4   :  { %1367 = vmatprep.subr.mxu0 %v3693_v62  ;;  %1438 = vmatprep.subr.mxu1 %v3696_v63 }
 0x3a5   :  { %1368 = vmatpush1.msra.mxu0 %v3699_v1  ;;  %1439 = vmatpush1.msra.mxu1 %v3702_v2 }
 0x3a6   :  { %1369 = vmatprep.subr.mxu0 %v3705_v3  ;;  %1440 = vmatprep.subr.mxu1 %v3708_v4 }
 0x3a7   :  { %1370 = vmatpush1.msra.mxu0 %v3711_v5  ;;  %1441 = vmatpush1.msra.mxu1 %v3714_v6 }
 0x3a8   :  { %1371 = vmatprep.subr.mxu0 %v3717_v7  ;;  %1442 = vmatprep.subr.mxu1 %v3720_v30 }
 0x3a9   :  { %1372 = vmatpush1.msra.mxu0 %v3723_v41  ;;  %1443 = vmatpush1.msra.mxu1 %v3726_v17 }
 0x3aa   :  { %1373 = vmatprep.subr.mxu0 %v3729_v0  ;;  %1444 = vmatprep.subr.mxu1 %v3732_v42  ;;  %v4376_v42 = vld [vmem:[#allocation46_spill] sm:$0xff] }
 0x3ab   :  { %1374 = vmatpush1.msra.mxu0 %v3735_v48  ;;  %1445 = vmatpush1.msra.mxu1 %v3738_v10 }
 0x3ac   :  { %1375 = vmatprep.subr.mxu0 %v3741_v35  ;;  %1446 = vmatprep.subr.mxu1 %v3744_v12  ;;  %v4375_v12 = vld [vmem:[#allocation43_spill] sm:$0xff] }
 0x3ad   :  { %1376 = vmatpush1.msra.mxu0 %v3747_v47  ;;  %1447 = vmatpush1.msra.mxu1 %v3750_v11  ;;  %v3765_v47 = vld [vmem:[#allocation8 + $0x8] sm:$0xff]  ;;  %v3769_v11 = vld [vmem:[#allocation8] sm:$0xff] }
 0x3ae   :  { %1377 = vmatprep.subr.mxu0 %v3753_v23  ;;  %1448 = vmatprep.subr.mxu1 %v3756_v9  ;;  %4372 = vst [vmem:[#allocation29_spill] sm:$0xff] %v3765_v47  ;;  %4373 = vst [vmem:[#allocation31_spill] sm:$0xff] %v3769_v11  ;;  %v4374_v9 = vld [vmem:[#allocation44_spill] sm:$0xff] }
 0x3af   :  { %1378 = vmatpush1.msra.mxu0 %v3759_v36  ;;  %1449 = vmatpush1.msra.mxu1 %v3762_v29  ;;  %v415_v29 = vpop.permute.xlu0 %414  ;;  %v447_v36 = vpop.permute.xlu1 %446 }
 0x3b0   :  { %1379 = vmatprep.subr.mxu0 %v3765_v47  ;;  %1450 = vmatprep.subr.mxu1 %v4347_v38  ;;  %v532_v47 = vsel %vm528_vm1, %v4374_v9, %v415_v29  ;;  %v4377_v9 = vld [vmem:[#allocation45_spill] sm:$0xff] }
 0x3b1   :  { %1380 = vmatpush1.msra.mxu0 %v3769_v11  ;;  %1413 = vmatprep.mubr.f32.mxu0 %v4349_v40  ;;  %v540_v11 = vsel %vm528_vm1, %v447_v36, %v4375_v12 }
 0x3b2   :  { %1451 = vmatpush1.msra.mxu1 %v4350_v43  ;;  %1484 = vmatprep.mubr.f32.mxu1 %v4349_v40 }
 0x3b3   :  { %1521 = vmatprep.subr.mxu0 %v3569_v44  ;;  %1592 = vmatprep.subr.mxu1 %v3572_v45  ;;  %v479_v40 = vpop.permute.xlu0 %478  ;;  %v511_v17 = vpop.permute.xlu1 %510 }
 0x3b4   :  { %v548_v45 = vsel %vm528_vm1, %v4376_v42, %v479_v40 }
 0x452   :  { %v1243_v38 = vpop.f32.mrf.mxu0  ;;  %v1314_v44 = vpop.f32.mrf.mxu1 }
 0x453   :  { %v1244_v23 = vadd.f32 %v1243_v38, %v532_v47  ;;  %v1315_v0 = vadd.f32 %v1314_v44, %v548_v45  ;;  %v556_v47 = vsel %vm528_vm1, %v511_v17, %v4377_v9  ;;  %v4381_v9 = vld [vmem:[#allocation17_spill] sm:$0xff] }
 0x454   :  { %v1245_v35 = vpop.f32.mrf.mxu0  ;;  %v1316_v41 = vpop.f32.mrf.mxu1 }
 0x455   :  { %v2357_v10 = vmul.f32 -1.442695, %v1244_v23  ;;  %v1246_v48 = vadd.f32 %v1245_v35, %v540_v11  ;;  %v2359_v29 = vmul.f32 -1.442695, %v1315_v0  ;;  %v1317_v36 = vadd.f32 %v1316_v41, %v556_v47  ;;  %v4382_v47 = vld [vmem:[#allocation18_spill] sm:$0xff] }
 0x457   :  { %2569 = vpow2.f32 %v2357_v10  ;;  %v2358_v43 = vmul.f32 -1.442695, %v1246_v48 }
 0x459   :  { %2571 = vpow2.f32 %v2358_v43 }
 0x45a   :  { %2573 = vpow2.f32 %v2359_v29  ;;  %v4380_v29 = vld [vmem:[#allocation37_spill] sm:$0xff] }
 0x464   :  { %v2570_v38 = vpop.eup %2569 }
 0x465   :  { %v1328_v12 = vadd.f32 1.0, %v2570_v38  ;;  %v4383_v38 = vld [vmem:[#allocation19_spill] sm:$0xff] }
 0x466   :  { %v2572_v23 = vpop.eup %2571 }
 0x467   :  { %2575 = vrcp.f32 %v1328_v12  ;;  %v1329_v48 = vadd.f32 1.0, %v2572_v23  ;;  %v2574_v10 = vpop.eup %2573  ;;  %v4385_v12 = vld [vmem:[#allocation21_spill] sm:$0xff]  ;;  %v4386_v23 = vld [vmem:[#allocation22_spill] sm:$0xff] }
 0x468   :  { %2577 = vtanh.f32 %v1317_v36  ;;  %v1330_v44 = vadd.f32 1.0, %v2574_v10  ;;  %v4384_v36 = vld [vmem:[#allocation20_spill] sm:$0xff] }
 0x469   :  { %2579 = vrcp.f32 %v1329_v48  ;;  %v4387_v48 = vld [vmem:[#allocation23_spill] sm:$0xff]  ;;  %v4388_v10 = vld [vmem:[#allocation24_spill] sm:$0xff] }
 0x46a   :  { %2581 = vrcp.f32 %v1330_v44  ;;  %v4392_v44 = vld [vmem:[#allocation28_spill] sm:$0xff] }
 0x474   :  { %v2576_v35 = vpop.eup %2575 }
 0x475   :  { %v2578_v11 = vpop.eup %2577 }
 0x476   :  { %v2580_v40 = vpop.eup %2579  ;;  %v1339_v0 = vmul.f32 %v2578_v11, %v2576_v35  ;;  %v4389_v35 = vld [vmem:[#allocation25_spill] sm:$0xff]  ;;  %v4390_v11 = vld [vmem:[#allocation26_spill] sm:$0xff] }
 0x477   :  { %v1338_v45 = vmul.f32 %v2580_v40, %v3584_v18  ;;  %v2582_v41 = vpop.eup %2581  ;;  %v4379_v18 = vld [vmem:[#allocation38_spill] sm:$0xff]  ;;  %v4391_v40 = vld [vmem:[#allocation27_spill] sm:$0xff] }
 0x479   :  { %v3786_v42 = vadd.f32 %v1339_v0, %v1338_v45  ;;  %v4393_v45 = vld [vmem:[#allocation29_spill] sm:$0xff]  ;;  %v3852_v0 = vld [vmem:[#allocation8 + $0x18] sm:$0xff] }
 0x47a   :  { %4394 = vst [vmem:[#allocation33_spill] sm:$0xff] %v3852_v0 }
 0x47b   :  { %2583 = vtanh.f32 %v3786_v42 }
 0x488   :  { %v2584_v17 = vpop.eup %2583 }
 0x489   :  { %v3789_v43 = vmul.f32 %v2584_v17, %v2582_v41  ;;  %v4395_v41 = vld [vmem:[#allocation31_spill] sm:$0xff]  ;;  %v4396_v17 = vmov 0.0  }
 0x48b   :  { %4378 = vst [vmem:[#allocation30_spill] sm:$0xff] %v3789_v43  ;;  %1414 = vmatmul.mubr.f32.vlgmr.msra.gmra.mxu0 %v3789_v43  ;;  %1485 = vmatmul.mubr.f32.vlgmr.msra.gmra.mxu1 %v3789_v43  ;;  %v3857_v43 = vld [vmem:[#allocation8 + $0x10] sm:$0xff] }
 0x48c   :  { %1522 = vmatpush1.msra.mxu0 %v3591_v24  ;;  %1593 = vmatpush1.msra.mxu1 %v3594_v8  ;;  %4397 = vst [vmem:[#allocation32_spill] sm:$0xff] %v3857_v43 }
 0x48d   :  { %1523 = vmatprep.subr.mxu0 %v3597_v13  ;;  %1594 = vmatprep.subr.mxu1 %v3600_v15 }
 0x48e   :  { %1524 = vmatpush1.msra.mxu0 %v3603_v14  ;;  %1595 = vmatpush1.msra.mxu1 %v3606_v16 }
 0x48f   :  { %1525 = vmatprep.subr.mxu0 %v3609_v19  ;;  %1596 = vmatprep.subr.mxu1 %v3612_v20 }
 0x490   :  { %1526 = vmatpush1.msra.mxu0 %v3615_v21  ;;  %1597 = vmatpush1.msra.mxu1 %v3618_v22 }
 0x491   :  { %1527 = vmatprep.subr.mxu0 %v3621_v25  ;;  %1598 = vmatprep.subr.mxu1 %v3624_v26 }
 0x492   :  { %1528 = vmatpush1.msra.mxu0 %v3627_v27  ;;  %1599 = vmatpush1.msra.mxu1 %v3630_v28 }
 0x493   :  { %1529 = vmatprep.subr.mxu0 %v3633_v31  ;;  %1600 = vmatprep.subr.mxu1 %v3636_v32 }
 0x494   :  { %1530 = vmatpush1.msra.mxu0 %v3639_v33  ;;  %1601 = vmatpush1.msra.mxu1 %v3642_v34 }
 0x495   :  { %1531 = vmatprep.subr.mxu0 %v3645_v37  ;;  %1602 = vmatprep.subr.mxu1 %v3648_v39 }
 0x496   :  { %1532 = vmatpush1.msra.mxu0 %v3651_v46  ;;  %1603 = vmatpush1.msra.mxu1 %v3654_v49 }
 0x497   :  { %1533 = vmatprep.subr.mxu0 %v3657_v50  ;;  %1604 = vmatprep.subr.mxu1 %v3660_v51 }
 0x498   :  { %1534 = vmatpush1.msra.mxu0 %v3663_v52  ;;  %1605 = vmatpush1.msra.mxu1 %v3666_v53 }
 0x499   :  { %1535 = vmatprep.subr.mxu0 %v3669_v54  ;;  %1606 = vmatprep.subr.mxu1 %v3672_v55 }
 0x49a   :  { %1536 = vmatpush1.msra.mxu0 %v3675_v56  ;;  %1607 = vmatpush1.msra.mxu1 %v3678_v57 }
 0x49b   :  { %1537 = vmatprep.subr.mxu0 %v3681_v58  ;;  %1608 = vmatprep.subr.mxu1 %v3684_v59 }
 0x49c   :  { %1538 = vmatpush1.msra.mxu0 %v3687_v60  ;;  %1609 = vmatpush1.msra.mxu1 %v3690_v61 }
 0x49d   :  { %1539 = vmatprep.subr.mxu0 %v3693_v62  ;;  %1610 = vmatprep.subr.mxu1 %v3696_v63 }
 0x49e   :  { %1540 = vmatpush1.msra.mxu0 %v3699_v1  ;;  %1611 = vmatpush1.msra.mxu1 %v3702_v2 }
 0x49f   :  { %1541 = vmatprep.subr.mxu0 %v3705_v3  ;;  %1612 = vmatprep.subr.mxu1 %v3708_v4 }
 0x4a0   :  { %1542 = vmatpush1.msra.mxu0 %v3711_v5  ;;  %1613 = vmatpush1.msra.mxu1 %v3714_v6 }
 0x4a1   :  { %1543 = vmatprep.subr.mxu0 %v3717_v7  ;;  %1614 = vmatprep.subr.mxu1 %v3720_v30 }
 0x4a2   :  { %1544 = vmatpush1.msra.mxu0 %v4379_v18  ;;  %1615 = vmatpush1.msra.mxu1 %v4380_v29 }
 0x4a3   :  { %1545 = vmatprep.subr.mxu0 %v4381_v9  ;;  %1616 = vmatprep.subr.mxu1 %v4382_v47  ;;  %v4402_v47 = vld [vmem:[#allocation50_spill] sm:$0xff] }
 0x4a4   :  { %1546 = vmatpush1.msra.mxu0 %v4383_v38  ;;  %1617 = vmatpush1.msra.mxu1 %v4384_v36 }
 0x4a5   :  { %1547 = vmatprep.subr.mxu0 %v4385_v12  ;;  %1618 = vmatprep.subr.mxu1 %v4386_v23 }
 0x4a6   :  { %1548 = vmatpush1.msra.mxu0 %v4387_v48  ;;  %1619 = vmatpush1.msra.mxu1 %v4388_v10 }
 0x4a7   :  { %1549 = vmatprep.subr.mxu0 %v4389_v35  ;;  %1620 = vmatprep.subr.mxu1 %v4390_v11  ;;  %v4398_v11 = vld [vmem:[#allocation16_spill] sm:$0xff] }
 0x4a8   :  { %1550 = vmatpush1.msra.mxu0 %v4391_v40  ;;  %1621 = vmatpush1.msra.mxu1 %v4392_v44  ;;  %v4399_v40 = vld [vmem:[#allocation36_spill] sm:$0xff]  ;;  %v417_v44 = vpop.permute.xlu0 %416 }
 0x4a9   :  { %1551 = vmatprep.subr.mxu0 %v4393_v45  ;;  %1622 = vmatprep.subr.mxu1 %v3852_v0  ;;  %v449_v45 = vpop.permute.xlu1 %448  ;;  %v4400_v35 = vld [vmem:[#allocation48_spill] sm:$0xff] }
 0x4aa   :  { %1552 = vmatpush1.msra.mxu0 %v4395_v41  ;;  %1585 = vmatprep.mubr.f32.mxu0 %v4396_v17  ;;  %v533_v10 = vsel %vm528_vm1, %v4400_v35, %v417_v44  ;;  %v4401_v41 = vld [vmem:[#allocation47_spill] sm:$0xff]  ;;  %v4403_v44 = vld [vmem:[#allocation49_spill] sm:$0xff] }
 0x4ab   :  { %1623 = vmatpush1.msra.mxu1 %v3857_v43  ;;  %1656 = vmatprep.mubr.f32.mxu1 %v4396_v17  ;;  %v541_v23 = vsel %vm528_vm1, %v449_v45, %v4401_v41 }
 0x4ac   :  { %1693 = vmatprep.subr.mxu0 %v4398_v11  ;;  %1764 = vmatprep.subr.mxu1 %v4399_v40  ;;  %v481_v17 = vpop.permute.xlu0 %480 }
 0x4ad   :  { %v549_v40 = vsel %vm528_vm1, %v4402_v47, %v481_v17  ;;  %v513_v29 = vpop.permute.xlu1 %512 }
 0x54b   :  { %v1415_v0 = vpop.f32.mrf.mxu0  ;;  %v1486_v11 = vpop.f32.mrf.mxu1 }
 0x54c   :  { %v1416_v48 = vadd.f32 %v1415_v0, %v533_v10  ;;  %v1487_v9 = vadd.f32 %v1486_v11, %v549_v40  ;;  %v557_v10 = vsel %vm528_vm1, %v513_v29, %v4403_v44  ;;  %v4407_v44 = vld [vmem:[#allocation17_spill] sm:$0xff] }
 0x54d   :  { %v1417_v12 = vpop.f32.mrf.mxu0  ;;  %v1488_v18 = vpop.f32.mrf.mxu1 }
 0x54e   :  { %v2360_v36 = vmul.f32 -1.442695, %v1416_v48  ;;  %v1418_v38 = vadd.f32 %v1417_v12, %v541_v23  ;;  %v2362_v35 = vmul.f32 -1.442695, %v1487_v9  ;;  %v1489_v45 = vadd.f32 %v1488_v18, %v557_v10  ;;  %v4408_v10 = vld [vmem:[#allocation18_spill] sm:$0xff] }
 0x550   :  { %2585 = vpow2.f32 %v2360_v36  ;;  %v2361_v43 = vmul.f32 -1.442695, %v1418_v38 }
 0x552   :  { %2587 = vpow2.f32 %v2361_v43 }
 0x553   :  { %2589 = vpow2.f32 %v2362_v35  ;;  %v4406_v35 = vld [vmem:[#allocation37_spill] sm:$0xff] }
 0x55d   :  { %v2586_v0 = vpop.eup %2585 }
 0x55e   :  { %v1500_v41 = vadd.f32 1.0, %v2586_v0  ;;  %v4409_v0 = vld [vmem:[#allocation19_spill] sm:$0xff] }
 0x55f   :  { %v2588_v48 = vpop.eup %2587 }
 0x560   :  { %2591 = vrcp.f32 %v1500_v41  ;;  %v1501_v38 = vadd.f32 1.0, %v2588_v48  ;;  %v2590_v43 = vpop.eup %2589  ;;  %v4411_v41 = vld [vmem:[#allocation21_spill] sm:$0xff]  ;;  %v4412_v48 = vld [vmem:[#allocation22_spill] sm:$0xff] }
 0x561   :  { %2593 = vtanh.f32 %v1489_v45  ;;  %v1502_v23 = vadd.f32 1.0, %v2590_v43  ;;  %v4410_v45 = vld [vmem:[#allocation20_spill] sm:$0xff] }
 0x562   :  { %2595 = vrcp.f32 %v1501_v38  ;;  %v4413_v38 = vld [vmem:[#allocation23_spill] sm:$0xff]  ;;  %v4414_v43 = vld [vmem:[#allocation24_spill] sm:$0xff] }
 0x563   :  { %2597 = vrcp.f32 %v1502_v23  ;;  %v4418_v23 = vld [vmem:[#allocation28_spill] sm:$0xff] }
 0x56d   :  { %v2592_v36 = vpop.eup %2591 }
 0x56e   :  { %v2594_v12 = vpop.eup %2593 }
 0x56f   :  { %v2596_v47 = vpop.eup %2595  ;;  %v1511_v9 = vmul.f32 %v2594_v12, %v2592_v36  ;;  %v4415_v36 = vld [vmem:[#allocation25_spill] sm:$0xff]  ;;  %v4416_v12 = vld [vmem:[#allocation26_spill] sm:$0xff] }
 0x570   :  { %v1510_v11 = vmul.f32 %v2596_v47, %v3786_v42  ;;  %v2598_v18 = vpop.eup %2597  ;;  %v4405_v42 = vld [vmem:[#allocation38_spill] sm:$0xff]  ;;  %v4417_v47 = vld [vmem:[#allocation27_spill] sm:$0xff] }
 0x572   :  { %v3872_v40 = vadd.f32 %v1511_v9, %v1510_v11  ;;  %v4419_v11 = vld [vmem:[#allocation29_spill] sm:$0xff] }
 0x573   :  { %v4420_v9 = vld [vmem:[#allocation33_spill] sm:$0xff] }
 0x574   :  { %2599 = vtanh.f32 %v3872_v40 }
 0x581   :  { %v2600_v29 = vpop.eup %2599 }
 0x582   :  { %v3875_v17 = vmul.f32 %v2600_v29, %v2598_v18  ;;  %v4421_v18 = vld [vmem:[#allocation31_spill] sm:$0xff]  ;;  %v4422_v29 = vmov 0.0  }
 0x584   :  { %4404 = vst [vmem:[#allocation34_spill] sm:$0xff] %v3875_v17  ;;  %1586 = vmatmul.mubr.f32.vlgmr.msra.gmra.mxu0 %v3875_v17  ;;  %1657 = vmatmul.mubr.f32.vlgmr.msra.gmra.mxu1 %v3875_v17  ;;  %v4423_v17 = vld [vmem:[#allocation32_spill] sm:$0xff] }
 0x585   :  { %1694 = vmatpush1.msra.mxu0 %v3591_v24  ;;  %1765 = vmatpush1.msra.mxu1 %v3594_v8 }
 0x586   :  { %1695 = vmatprep.subr.mxu0 %v3597_v13  ;;  %1766 = vmatprep.subr.mxu1 %v3600_v15 }
 0x587   :  { %1696 = vmatpush1.msra.mxu0 %v3603_v14  ;;  %1767 = vmatpush1.msra.mxu1 %v3606_v16 }
 0x588   :  { %1697 = vmatprep.subr.mxu0 %v3609_v19  ;;  %1768 = vmatprep.subr.mxu1 %v3612_v20 }
 0x589   :  { %1698 = vmatpush1.msra.mxu0 %v3615_v21  ;;  %1769 = vmatpush1.msra.mxu1 %v3618_v22 }
 0x58a   :  { %1699 = vmatprep.subr.mxu0 %v3621_v25  ;;  %1770 = vmatprep.subr.mxu1 %v3624_v26 }
 0x58b   :  { %1700 = vmatpush1.msra.mxu0 %v3627_v27  ;;  %1771 = vmatpush1.msra.mxu1 %v3630_v28 }
 0x58c   :  { %1701 = vmatprep.subr.mxu0 %v3633_v31  ;;  %1772 = vmatprep.subr.mxu1 %v3636_v32 }
 0x58d   :  { %1702 = vmatpush1.msra.mxu0 %v3639_v33  ;;  %1773 = vmatpush1.msra.mxu1 %v3642_v34 }
 0x58e   :  { %1703 = vmatprep.subr.mxu0 %v3645_v37  ;;  %1774 = vmatprep.subr.mxu1 %v3648_v39 }
 0x58f   :  { %1704 = vmatpush1.msra.mxu0 %v3651_v46  ;;  %1775 = vmatpush1.msra.mxu1 %v3654_v49 }
 0x590   :  { %1705 = vmatprep.subr.mxu0 %v3657_v50  ;;  %1776 = vmatprep.subr.mxu1 %v3660_v51 }
 0x591   :  { %1706 = vmatpush1.msra.mxu0 %v3663_v52  ;;  %1777 = vmatpush1.msra.mxu1 %v3666_v53 }
 0x592   :  { %1707 = vmatprep.subr.mxu0 %v3669_v54  ;;  %1778 = vmatprep.subr.mxu1 %v3672_v55 }
 0x593   :  { %1708 = vmatpush1.msra.mxu0 %v3675_v56  ;;  %1779 = vmatpush1.msra.mxu1 %v3678_v57 }
 0x594   :  { %1709 = vmatprep.subr.mxu0 %v3681_v58  ;;  %1780 = vmatprep.subr.mxu1 %v3684_v59 }
 0x595   :  { %1710 = vmatpush1.msra.mxu0 %v3687_v60  ;;  %1781 = vmatpush1.msra.mxu1 %v3690_v61 }
 0x596   :  { %1711 = vmatprep.subr.mxu0 %v3693_v62  ;;  %1782 = vmatprep.subr.mxu1 %v3696_v63 }
 0x597   :  { %1712 = vmatpush1.msra.mxu0 %v3699_v1  ;;  %1783 = vmatpush1.msra.mxu1 %v3702_v2 }
 0x598   :  { %1713 = vmatprep.subr.mxu0 %v3705_v3  ;;  %1784 = vmatprep.subr.mxu1 %v3708_v4 }
 0x599   :  { %1714 = vmatpush1.msra.mxu0 %v3711_v5  ;;  %1785 = vmatpush1.msra.mxu1 %v3714_v6 }
 0x59a   :  { %1715 = vmatprep.subr.mxu0 %v3717_v7  ;;  %1786 = vmatprep.subr.mxu1 %v3720_v30 }
 0x59b   :  { %1716 = vmatpush1.msra.mxu0 %v4405_v42  ;;  %1787 = vmatpush1.msra.mxu1 %v4406_v35 }
 0x59c   :  { %1717 = vmatprep.subr.mxu0 %v4407_v44  ;;  %1788 = vmatprep.subr.mxu1 %v4408_v10  ;;  %v4428_v44 = vld [vmem:[#allocation54_spill] sm:$0xff] }
 0x59d   :  { %1718 = vmatpush1.msra.mxu0 %v4409_v0  ;;  %1789 = vmatpush1.msra.mxu1 %v4410_v45 }
 0x59e   :  { %1719 = vmatprep.subr.mxu0 %v4411_v41  ;;  %1790 = vmatprep.subr.mxu1 %v4412_v48 }
 0x59f   :  { %1720 = vmatpush1.msra.mxu0 %v4413_v38  ;;  %1791 = vmatpush1.msra.mxu1 %v4414_v43  ;;  %v4424_v38 = vld [vmem:[#allocation36_spill] sm:$0xff] }
 0x5a0   :  { %1721 = vmatprep.subr.mxu0 %v4415_v36  ;;  %1792 = vmatprep.subr.mxu1 %v4416_v12  ;;  %v4425_v36 = vld [vmem:[#allocation16_spill] sm:$0xff]  ;;  %v419_v12 = vpop.permute.xlu0 %418 }
 0x5a1   :  { %1722 = vmatpush1.msra.mxu0 %v4417_v47  ;;  %1793 = vmatpush1.msra.mxu1 %v4418_v23  ;;  %v451_v47 = vpop.permute.xlu1 %450  ;;  %v4426_v43 = vld [vmem:[#allocation52_spill] sm:$0xff] }
 0x5a2   :  { %1723 = vmatprep.subr.mxu0 %v4419_v11  ;;  %1794 = vmatprep.subr.mxu1 %v4420_v9  ;;  %v534_v23 = vsel %vm528_vm1, %v4426_v43, %v419_v12  ;;  %v4427_v9 = vld [vmem:[#allocation51_spill] sm:$0xff]  ;;  %v4429_v12 = vld [vmem:[#allocation53_spill] sm:$0xff] }
 0x5a3   :  { %1724 = vmatpush1.msra.mxu0 %v4421_v18  ;;  %1757 = vmatprep.mubr.f32.mxu0 %v4422_v29  ;;  %v542_v18 = vsel %vm528_vm1, %v451_v47, %v4427_v9 }
 0x5a4   :  { %1795 = vmatpush1.msra.mxu1 %v4423_v17  ;;  %1828 = vmatprep.mubr.f32.mxu1 %v4422_v29  ;;  %v483_v29 = vpop.permute.xlu0 %482 }
 0x5a5   :  { %1936 = vmatprep.subr.mxu1 %v4424_v38  ;;  %1865 = vmatprep.subr.mxu0 %v4425_v36  ;;  %v550_v36 = vsel %vm528_vm1, %v4428_v44, %v483_v29  ;;  %v515_v42 = vpop.permute.xlu1 %514 }
 0x644   :  { %v1587_v11 = vpop.f32.mrf.mxu0  ;;  %v1658_v38 = vpop.f32.mrf.mxu1 }
 0x645   :  { %v1588_v41 = vadd.f32 %v1587_v11, %v534_v23  ;;  %v1659_v10 = vadd.f32 %v1658_v38, %v550_v36  ;;  %v558_v23 = vsel %vm528_vm1, %v515_v42, %v4429_v12 }
 0x646   :  { %v1589_v48 = vpop.f32.mrf.mxu0  ;;  %v1660_v35 = vpop.f32.mrf.mxu1 }
 0x647   :  { %v2363_v0 = vmul.f32 -1.442695, %v1588_v41  ;;  %v1590_v45 = vadd.f32 %v1589_v48, %v542_v18  ;;  %v2365_v43 = vmul.f32 -1.442695, %v1659_v10  ;;  %v1661_v47 = vadd.f32 %v1660_v35, %v558_v23 }
 0x649   :  { %2601 = vpow2.f32 %v2363_v0  ;;  %v2364_v17 = vmul.f32 -1.442695, %v1590_v45 }
 0x64b   :  { %2603 = vpow2.f32 %v2364_v17 }
 0x64c   :  { %2605 = vpow2.f32 %v2365_v43 }
 0x656   :  { %v2602_v11 = vpop.eup %2601 }
 0x657   :  { %v1672_v9 = vadd.f32 1.0, %v2602_v11 }
 0x658   :  { %v2604_v41 = vpop.eup %2603 }
 0x659   :  { %2607 = vrcp.f32 %v1672_v9  ;;  %v1673_v0 = vadd.f32 1.0, %v2604_v41  ;;  %v2606_v17 = vpop.eup %2605 }
 0x65a   :  { %2609 = vtanh.f32 %v1661_v47  ;;  %v1674_v18 = vadd.f32 1.0, %v2606_v17 }
 0x65b   :  { %2611 = vrcp.f32 %v1673_v0 }
 0x65c   :  { %2613 = vrcp.f32 %v1674_v18 }
 0x666   :  { %v2608_v45 = vpop.eup %2607 }
 0x667   :  { %v2610_v48 = vpop.eup %2609 }
 0x668   :  { %v2612_v44 = vpop.eup %2611  ;;  %v1683_v10 = vmul.f32 %v2610_v48, %v2608_v45 }
 0x669   :  { %v1682_v29 = vmul.f32 %v2612_v44, %v3872_v40  ;;  %v2614_v42 = vpop.eup %2613 }
 0x66b   :  { %v3954_v38 = vadd.f32 %v1683_v10, %v1682_v29  ;;  %v2055_v29 = vld [vmem:[%s4128_s7 + $0x70] sm:$0xff]  ;;  %v4453_v10 = vld [vmem:[#allocation63_spill] sm:$0xff] }
 0x66d   :  { %2615 = vtanh.f32 %v3954_v38 }
 0x67a   :  { %v2616_v35 = vpop.eup %2615 }
 0x67b   :  { %v3957_v36 = vmul.f32 %v2616_v35, %v2614_v42  ;;  %v2053_v42 = vld [vmem:[%s4128_s7 + $0x60] sm:$0xff]  ;;  %v2052_v35 = vld [vmem:[%s4128_s7 + $0x58] sm:$0xff] }
 0x67d   :  { %1758 = vmatmul.mubr.f32.vlgmr.msra.gmra.mxu0 %v3957_v36  ;;  %1829 = vmatmul.mubr.f32.vlgmr.msra.gmra.mxu1 %v3957_v36 }
 0x67e   :  { %1937 = vmatpush1.msra.mxu1 %v3594_v8  ;;  %1866 = vmatpush1.msra.mxu0 %v3591_v24  ;;  %v4430_v24 = vld [vmem:[#allocation37_spill] sm:$0xff]  ;;  %v4431_v8 = vld [vmem:[#allocation38_spill] sm:$0xff] }
 0x67f   :  { %1938 = vmatprep.subr.mxu1 %v3600_v15  ;;  %1867 = vmatprep.subr.mxu0 %v3597_v13  ;;  %v4432_v13 = vld [vmem:[#allocation18_spill] sm:$0xff]  ;;  %v4433_v15 = vld [vmem:[#allocation17_spill] sm:$0xff] }
 0x680   :  { %1939 = vmatpush1.msra.mxu1 %v3606_v16  ;;  %1868 = vmatpush1.msra.mxu0 %v3603_v14  ;;  %v4434_v14 = vld [vmem:[#allocation20_spill] sm:$0xff]  ;;  %v4435_v16 = vld [vmem:[#allocation19_spill] sm:$0xff] }
 0x681   :  { %1940 = vmatprep.subr.mxu1 %v3612_v20  ;;  %1869 = vmatprep.subr.mxu0 %v3609_v19  ;;  %v4436_v19 = vld [vmem:[#allocation22_spill] sm:$0xff]  ;;  %v4437_v20 = vld [vmem:[#allocation21_spill] sm:$0xff] }
 0x682   :  { %1941 = vmatpush1.msra.mxu1 %v3618_v22  ;;  %1870 = vmatpush1.msra.mxu0 %v3615_v21  ;;  %v4438_v21 = vld [vmem:[#allocation24_spill] sm:$0xff]  ;;  %v4439_v22 = vld [vmem:[#allocation23_spill] sm:$0xff] }
 0x683   :  { %1942 = vmatprep.subr.mxu1 %v3624_v26  ;;  %1871 = vmatprep.subr.mxu0 %v3621_v25  ;;  %v4440_v25 = vld [vmem:[#allocation26_spill] sm:$0xff]  ;;  %v4441_v26 = vld [vmem:[#allocation25_spill] sm:$0xff] }
 0x684   :  { %1943 = vmatpush1.msra.mxu1 %v3630_v28  ;;  %1872 = vmatpush1.msra.mxu0 %v3627_v27  ;;  %v4442_v27 = vld [vmem:[#allocation28_spill] sm:$0xff]  ;;  %v4443_v28 = vld [vmem:[#allocation27_spill] sm:$0xff] }
 0x685   :  { %1944 = vmatprep.subr.mxu1 %v3636_v32  ;;  %1873 = vmatprep.subr.mxu0 %v3633_v31  ;;  %v4444_v31 = vld [vmem:[#allocation33_spill] sm:$0xff] }
 0x686   :  { %1945 = vmatpush1.msra.mxu1 %v3642_v34  ;;  %1874 = vmatpush1.msra.mxu0 %v3639_v33  ;;  %v4445_v32 = vld [vmem:[#allocation29_spill] sm:$0xff]  ;;  %v4446_v33 = vld [vmem:[#allocation32_spill] sm:$0xff]  ;;  %v4447_v34 = vld [vmem:[#allocation31_spill] sm:$0xff] }
 0x687   :  { %1946 = vmatprep.subr.mxu1 %v3648_v39  ;;  %1875 = vmatprep.subr.mxu0 %v3645_v37  ;;  %v4448_v37 = vmov 0.0   ;;  %v2056_v39 = vld [vmem:[%s4128_s7 + $0x78] sm:$0xff] }
 0x688   :  { %1947 = vmatpush1.msra.mxu1 %v3654_v49  ;;  %1876 = vmatpush1.msra.mxu0 %v3651_v46  ;;  %v421_v46 = vpop.permute.xlu0 %420  ;;  %v453_v49 = vpop.permute.xlu1 %452 }
 0x689   :  { %1948 = vmatprep.subr.mxu1 %v3660_v51  ;;  %1877 = vmatprep.subr.mxu0 %v3657_v50  ;;  %v4449_v50 = vld [vmem:[#allocation56_spill] sm:$0xff] }
 0x68a   :  { %1949 = vmatpush1.msra.mxu1 %v3666_v53  ;;  %1878 = vmatpush1.msra.mxu0 %v3663_v52  ;;  %v535_v51 = vsel %vm528_vm1, %v4449_v50, %v421_v46  ;;  %v2075_v46 = vld [vmem:[#allocation10 + $0x50] sm:$0xff]  ;;  %v2073_v50 = vld [vmem:[#allocation10 + $0x40] sm:$0xff] }
 0x68b   :  { %1950 = vmatprep.subr.mxu1 %v3672_v55  ;;  %1879 = vmatprep.subr.mxu0 %v3669_v54  ;;  %v4450_v54 = vld [vmem:[#allocation55_spill] sm:$0xff] }
 0x68c   :  { %1951 = vmatpush1.msra.mxu1 %v3678_v57  ;;  %1880 = vmatpush1.msra.mxu0 %v3675_v56  ;;  %v543_v55 = vsel %vm528_vm1, %v453_v49, %v4450_v54  ;;  %v2074_v49 = vld [vmem:[#allocation10 + $0x48] sm:$0xff]  ;;  %v2069_v54 = vld [vmem:[#allocation10 + $0x20] sm:$0xff] }
 0x68d   :  { %1952 = vmatprep.subr.mxu1 %v3684_v59  ;;  %1881 = vmatprep.subr.mxu0 %v3681_v58 }
 0x68e   :  { %1953 = vmatpush1.msra.mxu1 %v3690_v61  ;;  %1882 = vmatpush1.msra.mxu0 %v3687_v60  ;;  %v485_v60 = vpop.permute.xlu0 %484 }
 0x68f   :  { %1954 = vmatprep.subr.mxu1 %v3696_v63  ;;  %1883 = vmatprep.subr.mxu0 %v3693_v62  ;;  %v4451_v62 = vld [vmem:[#allocation58_spill] sm:$0xff] }
 0x690   :  { %1955 = vmatpush1.msra.mxu1 %v3702_v2  ;;  %1884 = vmatpush1.msra.mxu0 %v3699_v1  ;;  %v551_v63 = vsel %vm528_vm1, %v4451_v62, %v485_v60  ;;  %v517_v2 = vpop.permute.xlu1 %516 }
 0x691   :  { %1956 = vmatprep.subr.mxu1 %v3708_v4  ;;  %1885 = vmatprep.subr.mxu0 %v3705_v3 }
 0x692   :  { %1957 = vmatpush1.msra.mxu1 %v3714_v6  ;;  %1886 = vmatpush1.msra.mxu0 %v3711_v5  ;;  %v4452_v5 = vld [vmem:[#allocation57_spill] sm:$0xff] }
 0x693   :  { %1958 = vmatprep.subr.mxu1 %v3720_v30  ;;  %1887 = vmatprep.subr.mxu0 %v3717_v7  ;;  %v559_v6 = vsel %vm528_vm1, %v517_v2, %v4452_v5  ;;  %v4459_v2 = vld [vmem:[#allocation59_spill] sm:$0xff] }
 0x694   :  { %1959 = vmatpush1.msra.mxu1 %v4430_v24  ;;  %1888 = vmatpush1.msra.mxu0 %v4431_v8  ;;  %v2051_v24 = vld [vmem:[%s4128_s7 + $0x50] sm:$0xff]  ;;  %v2050_v8 = vld [vmem:[%s4128_s7 + $0x48] sm:$0xff]  ;;  %v455_v60 = vpop.permute.xlu1 %454 }
 0x695   :  { %1960 = vmatprep.subr.mxu1 %v4432_v13  ;;  %1889 = vmatprep.subr.mxu0 %v4433_v15  ;;  %v2049_v13 = vld [vmem:[%s4128_s7 + $0x40] sm:$0xff]  ;;  %v2048_v15 = vld [vmem:[%s4128_s7 + $0x38] sm:$0xff] }
 0x696   :  { %1961 = vmatpush1.msra.mxu1 %v4434_v14  ;;  %1890 = vmatpush1.msra.mxu0 %v4435_v16  ;;  %v2047_v14 = vld [vmem:[%s4128_s7 + $0x30] sm:$0xff]  ;;  %v2046_v16 = vld [vmem:[%s4128_s7 + $0x28] sm:$0xff] }
 0x697   :  { %1962 = vmatprep.subr.mxu1 %v4436_v19  ;;  %1891 = vmatprep.subr.mxu0 %v4437_v20  ;;  %v2045_v19 = vld [vmem:[%s4128_s7 + $0x20] sm:$0xff]  ;;  %v2044_v20 = vld [vmem:[%s4128_s7 + $0x18] sm:$0xff] }
 0x698   :  { %1963 = vmatpush1.msra.mxu1 %v4438_v21  ;;  %1892 = vmatpush1.msra.mxu0 %v4439_v22  ;;  %v2043_v21 = vld [vmem:[%s4128_s7 + $0x10] sm:$0xff]  ;;  %v2042_v22 = vld [vmem:[%s4128_s7 + $0x8] sm:$0xff] }
 0x699   :  { %1964 = vmatprep.subr.mxu1 %v4440_v25  ;;  %1893 = vmatprep.subr.mxu0 %v4441_v26  ;;  %v2041_v25 = vld [vmem:[%s4128_s7] sm:$0xff] }
 0x69a   :  { %1965 = vmatpush1.msra.mxu1 %v4442_v27  ;;  %1894 = vmatpush1.msra.mxu0 %v4443_v28  ;;  %v4454_v26 = vld [vmem:[#allocation15_spill] sm:$0xff]  ;;  %v4456_v28 = vld [vmem:[#allocation30_spill] sm:$0xff] }
 0x69b   :  { %1966 = vmatprep.subr.mxu1 %v4444_v31  ;;  %1895 = vmatprep.subr.mxu0 %v4445_v32  ;;  %v4455_v27 = vld [vmem:[#allocation35_spill] sm:$0xff]  ;;  %v4457_v31 = vld [vmem:[#allocation34_spill] sm:$0xff] }
 0x69c   :  { %1967 = vmatpush1.msra.mxu1 %v4446_v33  ;;  %1896 = vmatpush1.msra.mxu0 %v4447_v34  ;;  %v2080_v32 = vld [vmem:[#allocation10 + $0x78] sm:$0xff]  ;;  %v2079_v33 = vld [vmem:[#allocation10 + $0x70] sm:$0xff]  ;;  %v2078_v34 = vld [vmem:[#allocation10 + $0x68] sm:$0xff] }
 0x69d   :  { %1929 = vmatprep.mubr.f32.mxu0 %v4448_v37  ;;  %2000 = vmatprep.mubr.f32.mxu1 %v4448_v37  ;;  %v2077_v37 = vld [vmem:[#allocation10 + $0x60] sm:$0xff] }
 0x69e   :  { %2465 = vmatprep.subr.mxu1 %v2056_v39  ;;  %2421 = vmatprep.subr.mxu0 %v2080_v32 }
 0x73d   :  { %v1759_v52 = vpop.f32.mrf.mxu0  ;;  %v1830_v61 = vpop.f32.mrf.mxu1 }
 0x73e   :  { %v1760_v53 = vadd.f32 %v1759_v52, %v535_v51  ;;  %v1831_v1 = vadd.f32 %v1830_v61, %v551_v63  ;;  %v2072_v51 = vld [vmem:[#allocation10 + $0x38] sm:$0xff]  ;;  %v2071_v52 = vld [vmem:[#allocation10 + $0x30] sm:$0xff]  ;;  %v4458_v61 = vld [vmem:[#allocation60_spill] sm:$0xff] }
 0x73f   :  { %v1761_v56 = vpop.f32.mrf.mxu0  ;;  %v1832_v3 = vpop.f32.mrf.mxu1 }
 0x740   :  { %v2366_v57 = vmul.f32 -1.442695, %v1760_v53  ;;  %v1762_v58 = vadd.f32 %v1761_v56, %v543_v55  ;;  %v2368_v4 = vmul.f32 -1.442695, %v1831_v1  ;;  %v1833_v30 = vadd.f32 %v1832_v3, %v559_v6  ;;  %v2070_v53 = vld [vmem:[#allocation10 + $0x28] sm:$0xff]  ;;  %v2068_v55 = vld [vmem:[#allocation10 + $0x18] sm:$0xff] }
 0x741   :  { %v2067_v56 = vld [vmem:[#allocation10 + $0x10] sm:$0xff]  ;;  %v544_v3 = vsel %vm528_vm1, %v455_v60, %v4459_v2 }
 0x742   :  { %2617 = vpow2.f32 %v2366_v57  ;;  %v2367_v59 = vmul.f32 -1.442695, %v1762_v58  ;;  %v2066_v57 = vld [vmem:[#allocation10 + $0x8] sm:$0xff]  ;;  %v2065_v58 = vld [vmem:[#allocation10] sm:$0xff] }
 0x744   :  { %2619 = vpow2.f32 %v2367_v59  ;;  %v423_v59 = vpop.permute.xlu0 %422 }
 0x745   :  { %2621 = vpow2.f32 %v2368_v4  ;;  %v536_v62 = vsel %vm528_vm1, %v4458_v61, %v423_v59 }
 0x74f   :  { %v2618_v7 = vpop.eup %2617 }
 0x750   :  { %v1844_v40 = vadd.f32 1.0, %v2618_v7 }
 0x751   :  { %v2620_v43 = vpop.eup %2619 }
 0x752   :  { %2623 = vrcp.f32 %v1844_v40  ;;  %v1845_v12 = vadd.f32 1.0, %v2620_v43  ;;  %v2622_v23 = vpop.eup %2621  ;;  %v4460_v43 = vld [vmem:[#allocation62_spill] sm:$0xff] }
 0x753   :  { %2625 = vtanh.f32 %v1833_v30  ;;  %v1846_v41 = vadd.f32 1.0, %v2622_v23  ;;  %v487_v30 = vpop.permute.xlu0 %486 }
 0x754   :  { %2627 = vrcp.f32 %v1845_v12  ;;  %v552_v12 = vsel %vm528_vm1, %v4460_v43, %v487_v30 }
 0x755   :  { %2629 = vrcp.f32 %v1846_v41  ;;  %v4461_v41 = vld [vmem:[#allocation61_spill] sm:$0xff] }
 0x75f   :  { %v2624_v11 = vpop.eup %2623 }
 0x760   :  { %v2626_v47 = vpop.eup %2625 }
 0x761   :  { %v2628_v9 = vpop.eup %2627  ;;  %v1855_v17 = vmul.f32 %v2626_v47, %v2624_v11  ;;  %v519_v11 = vpop.permute.xlu1 %518 }
 0x762   :  { %v1854_v0 = vmul.f32 %v2628_v9, %v3954_v38  ;;  %v2630_v48 = vpop.eup %2629  ;;  %v2054_v38 = vld [vmem:[%s4128_s7 + $0x68] sm:$0xff] }
 0x764   :  { %v4037_v45 = vadd.f32 %v1855_v17, %v1854_v0  ;;  %v560_v0 = vsel %vm528_vm1, %v519_v11, %v4461_v41 }
 0x766   :  { %2631 = vtanh.f32 %v4037_v45 }
 0x773   :  { %v2632_v44 = vpop.eup %2631 }
 0x774   :  { %v4040_v18 = vmul.f32 %v2632_v44, %v2630_v48 }
 0x776   :  { %1930 = vmatmul.mubr.f32.vlgmr.msra.gmra.mxu0 %v4040_v18  ;;  %2001 = vmatmul.mubr.f32.vlgmr.msra.gmra.mxu1 %v4040_v18 }
 0x777   :  { %2466 = vmatpush3.msra.mxu1 %v2056_v39  ;;  %2497 = vmatprep.mubr.f32.mxu1 %v4453_v10  ;;  %v2076_v39 = vld [vmem:[#allocation10 + $0x58] sm:$0xff] }
 0x778   :  { %2467 = vmatprep.subr.mxu1 %v2055_v29  ;;  %2422 = vmatpush3.msra.mxu0 %v2080_v32 }
 0x779   :  { %2468 = vmatpush3.msra.mxu1 %v2055_v29  ;;  %2423 = vmatprep.subr.mxu0 %v2079_v33 }
 0x77a   :  { %2469 = vmatprep.subr.mxu1 %v2054_v38  ;;  %2424 = vmatpush3.msra.mxu0 %v2079_v33 }
 0x77b   :  { %2470 = vmatpush3.msra.mxu1 %v2054_v38  ;;  %2425 = vmatprep.subr.mxu0 %v2078_v34 }
 0x77c   :  { %2471 = vmatprep.subr.mxu1 %v2053_v42  ;;  %2426 = vmatpush3.msra.mxu0 %v2078_v34 }
 0x77d   :  { %2472 = vmatpush3.msra.mxu1 %v2053_v42  ;;  %2427 = vmatprep.subr.mxu0 %v2077_v37 }
 0x77e   :  { %2473 = vmatprep.subr.mxu1 %v2052_v35  ;;  %2428 = vmatpush3.msra.mxu0 %v2077_v37 }
 0x77f   :  { %2474 = vmatpush3.msra.mxu1 %v2052_v35  ;;  %2429 = vmatprep.subr.mxu0 %v2076_v39 }
 0x780   :  { %2475 = vmatprep.subr.mxu1 %v2051_v24  ;;  %2430 = vmatpush3.msra.mxu0 %v2076_v39 }
 0x781   :  { %2476 = vmatpush3.msra.mxu1 %v2051_v24  ;;  %2431 = vmatprep.subr.mxu0 %v2075_v46 }
 0x782   :  { %2477 = vmatprep.subr.mxu1 %v2050_v8  ;;  %2432 = vmatpush3.msra.mxu0 %v2075_v46 }
 0x783   :  { %2478 = vmatpush3.msra.mxu1 %v2050_v8  ;;  %2433 = vmatprep.subr.mxu0 %v2074_v49 }
 0x784   :  { %2479 = vmatprep.subr.mxu1 %v2049_v13  ;;  %2434 = vmatpush3.msra.mxu0 %v2074_v49 }
 0x785   :  { %2480 = vmatpush3.msra.mxu1 %v2049_v13  ;;  %2435 = vmatprep.subr.mxu0 %v2073_v50 }
 0x786   :  { %2481 = vmatprep.subr.mxu1 %v2048_v15  ;;  %2436 = vmatpush3.msra.mxu0 %v2073_v50 }
 0x787   :  { %2482 = vmatpush3.msra.mxu1 %v2048_v15  ;;  %2437 = vmatprep.subr.mxu0 %v2072_v51 }
 0x788   :  { %2483 = vmatprep.subr.mxu1 %v2047_v14  ;;  %2438 = vmatpush3.msra.mxu0 %v2072_v51 }
 0x789   :  { %2484 = vmatpush3.msra.mxu1 %v2047_v14  ;;  %2439 = vmatprep.subr.mxu0 %v2071_v52 }
 0x78a   :  { %2485 = vmatprep.subr.mxu1 %v2046_v16  ;;  %2440 = vmatpush3.msra.mxu0 %v2071_v52 }
 0x78b   :  { %2486 = vmatpush3.msra.mxu1 %v2046_v16  ;;  %2441 = vmatprep.subr.mxu0 %v2070_v53 }
 0x78c   :  { %2487 = vmatprep.subr.mxu1 %v2045_v19  ;;  %2442 = vmatpush3.msra.mxu0 %v2070_v53 }
 0x78d   :  { %2488 = vmatpush3.msra.mxu1 %v2045_v19  ;;  %2443 = vmatprep.subr.mxu0 %v2069_v54 }
 0x78e   :  { %2489 = vmatprep.subr.mxu1 %v2044_v20  ;;  %2444 = vmatpush3.msra.mxu0 %v2069_v54 }
 0x78f   :  { %2490 = vmatpush3.msra.mxu1 %v2044_v20  ;;  %2445 = vmatprep.subr.mxu0 %v2068_v55 }
 0x790   :  { %2491 = vmatprep.subr.mxu1 %v2043_v21  ;;  %2446 = vmatpush3.msra.mxu0 %v2068_v55 }
 0x791   :  { %2492 = vmatpush3.msra.mxu1 %v2043_v21  ;;  %2447 = vmatprep.subr.mxu0 %v2067_v56 }
 0x792   :  { %2493 = vmatprep.subr.mxu1 %v2042_v22  ;;  %2448 = vmatpush3.msra.mxu0 %v2067_v56 }
 0x793   :  { %2494 = vmatpush3.msra.mxu1 %v2042_v22  ;;  %2449 = vmatprep.subr.mxu0 %v2066_v57 }
 0x794   :  { %2495 = vmatprep.subr.mxu1 %v2041_v25  ;;  %2450 = vmatpush3.msra.mxu0 %v2066_v57 }
 0x795   :  { %2496 = vmatpush3.msra.mxu1 %v2041_v25  ;;  %2451 = vmatprep.subr.mxu0 %v2065_v58 }
 0x796   :  { %2498 = vmatmul.mubr.f32.vlgmr.msra.gmra.mxu1 %v4454_v26  ;;  %2452 = vmatpush3.msra.mxu0 %v2065_v58 }
 0x797   :  { %2500 = vmatprep.mubr.f32.mxu1 %v4455_v27 }
 0x79a   :  { %2501 = vmatmul.mubr.f32.gmra.mxu1 %v4456_v28 }
 0x79b   :  { %2503 = vmatprep.mubr.f32.mxu1 %v4457_v31 }
 0x79e   :  { %2504 = vmatmul.mubr.f32.gmra.mxu1 %v3957_v36 }
 0x79f   :  { %2506 = vmatprep.mubr.f32.mxu1 %v4040_v18 }
 0x836   :  { %v1931_v63 = vpop.f32.mrf.mxu0  ;;  %v2002_v40 = vpop.f32.mrf.mxu1 }
 0x837   :  { %v1932_v1 = vadd.f32 %v1931_v63, %v536_v62  ;;  %v2003_v23 = vadd.f32 %v2002_v40, %v552_v12 }
 0x838   :  { %v1933_v4 = vpop.f32.mrf.mxu0  ;;  %v2004_v47 = vpop.f32.mrf.mxu1 }
 0x839   :  { %v2369_v5 = vmul.f32 -1.442695, %v1932_v1  ;;  %v1934_v6 = vadd.f32 %v1933_v4, %v544_v3  ;;  %v2371_v9 = vmul.f32 -1.442695, %v2003_v23  ;;  %v2005_v48 = vadd.f32 %v2004_v47, %v560_v0 }
 0x83b   :  { %2633 = vpow2.f32 %v2369_v5  ;;  %v2370_v7 = vmul.f32 -1.442695, %v1934_v6 }
 0x83d   :  { %2635 = vpow2.f32 %v2370_v7 }
 0x83e   :  { %2637 = vpow2.f32 %v2371_v9 }
 0x848   :  { %v2634_v17 = vpop.eup %2633 }
 0x849   :  { %v2016_v44 = vadd.f32 1.0, %v2634_v17 }
 0x84a   :  { %v2636_v29 = vpop.eup %2635 }
 0x84b   :  { %2639 = vrcp.f32 %v2016_v44  ;;  %v2017_v38 = vadd.f32 1.0, %v2636_v29  ;;  %v2638_v42 = vpop.eup %2637 }
 0x84c   :  { %2641 = vtanh.f32 %v2005_v48  ;;  %v2018_v13 = vadd.f32 1.0, %v2638_v42 }
 0x84d   :  { %2643 = vrcp.f32 %v2017_v38 }
 0x84e   :  { %2645 = vrcp.f32 %v2018_v13 }
 0x858   :  { %v2640_v35 = vpop.eup %2639 }
 0x859   :  { %v2642_v24 = vpop.eup %2641 }
 0x85a   :  { %v2644_v8 = vpop.eup %2643  ;;  %v2027_v14 = vmul.f32 %v2642_v24, %v2640_v35 }
 0x85b   :  { %v2026_v15 = vmul.f32 %v2644_v8, %v4037_v45  ;;  %v2646_v19 = vpop.eup %2645  ;;  %v2499_v45 = vpop.f32.mrf.mxu1 }
 0x85d   :  { %v2028_v16 = vadd.f32 %v2027_v14, %v2026_v15  ;;  %v2252_v22 = vpop.f32.mrf.mxu1 }
 0x85f   :  { %2647 = vtanh.f32 %v2028_v16  ;;  %v2502_v25 = vpop.f32.mrf.mxu1 }
 0x861   :  { %v2262_v32 = vpop.f32.mrf.mxu1 }
 0x86c   :  { %v2648_v20 = vpop.eup %2647 }
 0x86d   :  { %v2030_v21 = vmul.f32 %v2648_v20, %v2646_v19 }
 0x86f   :  { %2453 = vmatprep.mubr.f32.mxu0 %v2030_v21  ;;  %2507 = vmatmul.mubr.f32.gmra.mxu1 %v2030_v21 }
 0x870   :  { %2454 = vmatmul.mubr.f32.vlgmr.msra.gmra.mxu0 %v4040_v18  ;;  %v2372_v18 = vld [vmem:[%s4130_s9] ss:$0 sm:$0xff]  ;;  %s2810_s9 = smov [#allocation11]  }
 0x871   :  { %2456 = vmatprep.mubr.f32.mxu0 %v3957_v36  ;;  %s2319_s15 = sshll.u32 %s2810_s9, 4  ;;  %s2320_s15 = int_to_ptr.vmem [resolvable:$true] %s2319_s15 }
 0x872   :  { %s2773_s16 = scalar_lea.vmem %s2320_s15, 1024  ;;  %p2778_p2 = scmp.lt.s32.totalorder %s2320_s15, %s2320_s15 }
 0x873   :  { %p2774_p1 = scmp.ne.s32.totalorder %s2320_s15, %s2773_s16  ;;  %p2779_p3 = scmp.lt.s32.totalorder %s2773_s16, %s2773_s16 }
 0x874   :  { %2457 = vmatmul.mubr.f32.gmra.mxu0 %v4457_v31 }
 0x875   :  { %2459 = vmatprep.mubr.f32.mxu0 %v4456_v28  ;;  %v2505_v28 = vpop.f32.mrf.mxu1  ;;  %p2780_p4 = por %p2779_p3, %p2778_p2 }
 0x877   :  { %v2272_v50 = vpop.f32.mrf.mxu1  ;;  %p2781_p5 = pnand %p2780_p4, %p2774_p1 }
 0x878   :  { %2460 = vmatmul.mubr.f32.gmra.mxu0 %v4455_v27 }
 0x879   :  { %2462 = vmatprep.mubr.f32.mxu0 %v4454_v26 }
 0x87c   :  { %2463 = vmatmul.mubr.f32.gmra.mxu0 %v4453_v10 }
 0x92f   :  { %v2508_v54 = vpop.f32.mrf.mxu1 }
 0x930   :  { %v2455_v33 = vpop.f32.mrf.mxu0 }
 0x931   :  { %v2258_v36 = vadd.f32 %v2499_v45, %v2455_v33  ;;  %v2282_v61 = vpop.f32.mrf.mxu1 }
 0x932   :  { %v2147_v34 = vpop.f32.mrf.mxu0 }
 0x933   :  { %v2299_v31 = vadd.f32 %v2372_v18, %v2258_v36  ;;  %v2253_v37 = vadd.f32 %v2252_v22, %v2147_v34 }
 0x934   :  { %v2458_v39 = vpop.f32.mrf.mxu0 }
 0x935   :  { %2307 = vst [vmem:[#allocation11 + $0x8] sm:$0xff] %v2299_v31  ;;  %v2298_v27 = vadd.f32 %v2372_v18, %v2253_v37  ;;  %v2268_v26 = vadd.f32 %v2502_v25, %v2458_v39 }
 0x936   :  { %v2157_v46 = vpop.f32.mrf.mxu0 }
 0x937   :  { %2306 = vst [vmem:[#allocation11] sm:$0xff] %v2298_v27  ;;  %v2301_v10 = vadd.f32 %v2372_v18, %v2268_v26  ;;  %v2263_v49 = vadd.f32 %v2262_v32, %v2157_v46 }
 0x938   :  { %v2461_v51 = vpop.f32.mrf.mxu0 }
 0x939   :  { %2309 = vst [vmem:[#allocation11 + $0x18] sm:$0xff] %v2301_v10  ;;  %v2300_v52 = vadd.f32 %v2372_v18, %v2263_v49  ;;  %v2278_v53 = vadd.f32 %v2505_v28, %v2461_v51 }
 0x93a   :  { %v2167_v55 = vpop.f32.mrf.mxu0 }
 0x93b   :  { %2308 = vst [vmem:[#allocation11 + $0x10] sm:$0xff] %v2300_v52  ;;  %v2303_v56 = vadd.f32 %v2372_v18, %v2278_v53  ;;  %v2273_v57 = vadd.f32 %v2272_v50, %v2167_v55 }
 0x93c   :  { %v2464_v58 = vpop.f32.mrf.mxu0 }
 0x93d   :  { %2311 = vst [vmem:[#allocation11 + $0x28] sm:$0xff] %v2303_v56  ;;  %v2302_v59 = vadd.f32 %v2372_v18, %v2273_v57  ;;  %v2288_v60 = vadd.f32 %v2508_v54, %v2464_v58 }
 0x93e   :  { %v2177_v62 = vpop.f32.mrf.mxu0 }
 0x93f   :  { %2310 = vst [vmem:[#allocation11 + $0x20] sm:$0xff] %v2302_v59  ;;  %v2305_v63 = vadd.f32 %v2372_v18, %v2288_v60  ;;  %v2283_v1 = vadd.f32 %v2282_v61, %v2177_v62 }
 0x941   :  { %2313 = vst [vmem:[#allocation11 + $0x38] sm:$0xff] %v2305_v63  ;;  %v2304_v2 = vadd.f32 %v2372_v18, %v2283_v1 }
 0x943   :  { %2312 = vst [vmem:[#allocation11 + $0x30] sm:$0xff] %v2304_v2 }
 0x944   :  { %2784 = shalt.err (!%p2781_p5)
}
 0x945   :  { %2325 = dma.vmem_to_hbm [thread:$0]  %s2320_s15, 1024, %s4131_s10, [#allocation7], %s2806_s29, %s2806_s29, %s2807_s30  }
 0x946   :  { %2797 = dma.done.wait [#allocation7], 1024  }
 0x947   :  { %2798 = vsyncadd [#allocation7], 4294966272 }
 0x948   :  { %2329 = vsyncpa [#allocation6], 1 }
 0x949   :  { %2330 = vsyncpa [#allocation9], 1 }
 0x94a   :  { %2331 = vsyncpa [#allocation7], 1 }

</bundles_post_ra>
